<compile_context>
chip_gen: v6e
topology: v6e:2x2x1
jax: 0.10.0
libtpu: 0.0.40
codegen_flags: <defaults>
</compile_context>

<pallas_src>
import jax
import jax.numpy as jnp
from jax.experimental import pallas as pl
from jax.experimental.pallas import tpu as pltpu

BN_EPS = 1e-5


def bottleneck_kernel(x_ref, w1_ref, w2_ref, w3_ref, bn_ref,
                      o_ref, pad_ref, col_ref):
    """One grid step = B_TILE images.

    Shapes:
      x_ref   : (B, H*W, Cin)       bf16  input slab (NHWC, HW flattened)
      w1_ref  : (Cin, P)            bf16  conv1 1x1
      w2_ref  : (3, 3*P, P)         bf16  conv2 3x3; chunk-kh rows ordered (kw, cin)
      w3_ref  : (P, Cout)           bf16  conv3 1x1
      bn_ref  : (6, Cout)           f32   rows: s1,h1,s2,h2,s3,h3 (folded BN)
      o_ref   : (B, H*W, Cout)      bf16  output slab
      pad_ref : (B, H+2, Wpad, P)   bf16  zero-halo padded conv2 input (scratch)
      col_ref : (B*H*W, 3*P)        bf16  per-kh im2col chunk (scratch)
    """
    B, HW, Cin = x_ref.shape
    _, Hp2, Wpad, P = pad_ref.shape
    H = Hp2 - 2
    W = HW // H
    Cout = w3_ref.shape[1]
    BHW = B * HW

    # Folded eval-mode BN scale/shift rows -> one FMA per stage below.
    s1 = bn_ref[0:1, 0:P]
    h1 = bn_ref[1:2, 0:P]
    s2 = bn_ref[2:3, 0:P]
    h2 = bn_ref[3:4, 0:P]
    s3 = bn_ref[4:5, 0:Cout]
    h3 = bn_ref[5:6, 0:Cout]

    # ---- conv1 (1x1): bf16 MXU operands, f32 accumulation; BN + ReLU -------
    x_bf = x_ref[...].reshape(BHW, Cin)
    y1 = jnp.dot(x_bf, w1_ref[...], preferred_element_type=jnp.float32)
    y1 = jnp.maximum(y1 * s1 + h1, 0.0)                                  # (BHW, P)

    # ---- conv2 (3x3, pad=1) -------------------------------------------------
    # Zero only the 1-px halo (plus the alignment padding columns), every step:
    # safe under megacore "parallel" sharding (each core's private scratch gets
    # zeroed on its own steps), and the interior is fully overwritten anyway.
    zero_row = jnp.zeros((B, 1, Wpad, P), jnp.bfloat16)
    pad_ref[:, 0:1, :, :] = zero_row
    pad_ref[:, H + 1:H + 2, :, :] = zero_row
    pad_ref[:, 1:H + 1, 0:1, :] = jnp.zeros((B, H, 1, P), jnp.bfloat16)
    pad_ref[:, 1:H + 1, W + 1:Wpad, :] = jnp.zeros(
        (B, H, Wpad - (W + 1), P), jnp.bfloat16)
    pad_ref[:, 1:H + 1, 1:W + 1, :] = y1.astype(jnp.bfloat16).reshape(B, H, W, P)

    # 3 kh-chunks: build a (BHW, 3P) im2col chunk, accumulate its K=3P matmul
    # in f32.  Interleaving lets the scheduler hide the next chunk's stores
    # under the current chunk's MXU work.
    y2 = jnp.zeros((BHW, P), jnp.float32)
    for kh in range(3):
        for kw in range(3):
            col_ref[:, kw * P:(kw + 1) * P] = (
                pad_ref[:, kh:kh + H, kw:kw + W, :].reshape(BHW, P))
        y2 = y2 + jnp.dot(col_ref[...], w2_ref[kh],
                          preferred_element_type=jnp.float32)            # (BHW, P)
    y2 = jnp.maximum(y2 * s2 + h2, 0.0)

    # ---- conv3 (1x1 -> Cout): BN, residual add (f32 formed only here), ReLU -
    y3 = jnp.dot(y2.astype(jnp.bfloat16), w3_ref[...],
                 preferred_element_type=jnp.float32)                     # (BHW, Cout)
    y3 = y3 * s3 + h3
    residual = x_ref[...].reshape(BHW, Cin).astype(jnp.float32)
    out = jnp.maximum(y3 + residual, 0.0)

    # bf16 store halves output HBM traffic.  The minor dim (Cout) is kept
    # intact so this is a plain slab store (lane-dense whenever Cout >= 128,
    # i.e. every real Bottleneck configuration).
    # TODO(synk): for toy Cout < 128 a (H, W*Cout) lane-dense fold could shave
    # masked stores; skipped to avoid a minor-dim relayout.
    o_ref[...] = out.astype(o_ref.dtype).reshape(B, HW, Cout)


def _fold_bn(bn):
    """Fold eval-mode BN (running stats + affine) into per-channel scale/shift."""
    scale = (bn["g"] * jax.lax.rsqrt(bn["rv"] + BN_EPS)).astype(jnp.float32)
    shift = (bn["b"] - bn["rm"] * scale).astype(jnp.float32)
    return scale, shift


def _round_up(x, m):
    return (x + m - 1) // m * m


def _vmem_bytes(b, H, W, Wpad, Cin, P, Cout):
    """Rough per-step VMEM footprint: double-buffered I/O blocks + weights +
    scratch + live f32 intermediates."""
    hw = H * W
    io = 2 * b * hw * (Cin + Cout) * 2                      # bf16 in/out, double-buffered
    weights = 2 * ((Cin * P + 9 * P * P + P * Cout) * 2 + 6 * Cout * 4)
    scratch = b * ((H + 2) * Wpad + 3 * hw) * P * 2         # pad_ref + col_ref (bf16)
    live = b * hw * (2 * P + 2 * Cout) * 4                  # f32 intermediates (rough)
    return io + weights + scratch + live


def _pick_b_tile(N, H, W, Wpad, Cin, P, Cout, budget_bytes):
    """Largest divisor of N fitting the VMEM budget while keeping >= 2 grid
    steps (so the 'parallel' batch axis can still be sharded across cores)."""
    best = 1
    for b in range(1, N + 1):
        if N % b:
            continue
        if N >= 2 and N // b < 2:
            continue
        if _vmem_bytes(b, H, W, Wpad, Cin, P, Cout) <= budget_bytes:
            best = b
    return best


def bottleneck_forward(x_nchw, params):
    N, Cin, H, W = x_nchw.shape
    P = params["w1"].shape[1]
    Cout = 4 * P
    assert Cin == Cout, "downsample=None, stride=1 => inplanes == planes*4"

    Wpad = _round_up(W + 2, 8)                       # sublane-aligned padded width
    B_TILE = _pick_b_tile(N, H, W, Wpad, Cin, P, Cout, budget_bytes=36 << 20)
    est = _vmem_bytes(B_TILE, H, W, Wpad, Cin, P, Cout)
    # Cap below v7x's 64 MiB physical VMEM; keep >= 32 MiB (v5e scoped default
    # is only 16 MiB, v6e 32 MiB).
    vmem_limit = int(min(48 << 20, max(32 << 20, 2 * est)))

    # NCHW -> NHWC -> matmul-ready (N, H*W, Cin) slab; bf16 matmul operands.
    x = jnp.transpose(x_nchw, (0, 2, 3, 1)).reshape(N, H * W, Cin)
    x_bf16 = x.astype(jnp.bfloat16)

    w1 = params["w1"].astype(jnp.bfloat16)                        # (Cin, P)
    w2 = params["w2"].reshape(3, 3 * P, P).astype(jnp.bfloat16)   # (kh, kw*cin, cout)
    w3 = params["w3"].astype(jnp.bfloat16)                        # (P, Cout)

    s1, h1 = _fold_bn(params["bn1"])
    s2, h2 = _fold_bn(params["bn2"])
    s3, h3 = _fold_bn(params["bn3"])

    def _padc(v):                                   # pad P-sized rows up to Cout
        return jnp.pad(v, (0, Cout - v.shape[0]))

    bn_pack = jnp.stack(
        [_padc(s1), _padc(h1), _padc(s2), _padc(h2), s3, h3], axis=0)  # (6, Cout)

    const2 = lambda n: (0, 0)
    const3 = lambda n: (0, 0, 0)

    out_slab = pl.pallas_call(
        bottleneck_kernel,
        out_shape=jax.ShapeDtypeStruct((N, H * W, Cout), jnp.bfloat16),
        grid_spec=pltpu.PrefetchScalarGridSpec(
            num_scalar_prefetch=0,
            grid=(N // B_TILE,),
            in_specs=[
                pl.BlockSpec((B_TILE, H * W, Cin), lambda n: (n, 0, 0)),  # x
                pl.BlockSpec((Cin, P), const2),                           # w1
                pl.BlockSpec((3, 3 * P, P), const3),                      # w2
                pl.BlockSpec((P, Cout), const2),                          # w3
                pl.BlockSpec((6, Cout), const2),                          # packed BN
            ],
            out_specs=pl.BlockSpec((B_TILE, H * W, Cout), lambda n: (n, 0, 0)),
            scratch_shapes=[
                pltpu.VMEM((B_TILE, H + 2, Wpad, P), jnp.bfloat16),  # padded conv2 input
                pltpu.VMEM((B_TILE * H * W, 3 * P), jnp.bfloat16),   # per-kh im2col chunk
            ],
        ),
        compiler_params=pltpu.CompilerParams(
            dimension_semantics=("parallel",),      # megacore-shard the batch axis
            vmem_limit_bytes=vmem_limit,
        ),
    )(x_bf16, w1, w2, w3, bn_pack)

    out = out_slab.reshape(N, H, W, Cout).astype(jnp.float32)
    return jnp.transpose(out, (0, 3, 1, 2))         # NHWC -> NCHW


def reference(x_nchw, params):
    """Pure-JAX f32 reference with identical (eval-mode BN) math, NHWC inside."""
    x = jnp.transpose(x_nchw, (0, 2, 3, 1)).astype(jnp.float32)
    N, H, W, Cin = x.shape
    P = params["w1"].shape[1]

    def bn(y, p):
        return (y - p["rm"]) * jax.lax.rsqrt(p["rv"] + BN_EPS) * p["g"] + p["b"]

    y1 = jnp.einsum("nhwc,cp->nhwp", x, params["w1"])
    y1 = jnp.maximum(bn(y1, params["bn1"]), 0.0)
    xp = jnp.pad(y1, ((0, 0), (1, 1), (1, 1), (0, 0)))
    y2 = jnp.zeros((N, H, W, P), jnp.float32)
    for kh in range(3):
        for kw in range(3):
            y2 = y2 + jnp.einsum("nhwc,cp->nhwp",
                                 xp[:, kh:kh + H, kw:kw + W, :],
                                 params["w2"][kh, kw])
    y2 = jnp.maximum(bn(y2, params["bn2"]), 0.0)
    y3 = bn(jnp.einsum("nhwc,cp->nhwp", y2, params["w3"]), params["bn3"])
    out = jnp.maximum(y3 + x, 0.0)
    return jnp.transpose(out, (0, 3, 1, 2))


def _make_bn(key, c):
    k1, k2, k3, k4 = jax.random.split(key, 4)
    return dict(
        g=jax.random.uniform(k1, (c,), jnp.float32, 0.5, 1.5),
        b=0.1 * jax.random.normal(k2, (c,), jnp.float32),
        rm=0.1 * jax.random.normal(k3, (c,), jnp.float32),
        rv=jax.random.uniform(k4, (c,), jnp.float32, 0.5, 1.5),
    )


if __name__ == "__main__":
    # Small shapes consistent with the module: batch=2, inplanes=32, planes=8
    # (expansion=4, downsample=None => inplanes == planes*4), spatial 8x8.
    N, Cin, H, W = 2, 32, 8, 8
    P = Cin // 4

    key = jax.random.PRNGKey(0)
    kx, kw1, kw2, kw3, kb1, kb2, kb3 = jax.random.split(key, 7)
    x = jax.random.normal(kx, (N, Cin, H, W), jnp.float32)

    params = dict(
        # conv weights stored matmul-ready: (Cin, P), (kh, kw, Cin', P), (P, 4P)
        w1=jax.random.normal(kw1, (Cin, P), jnp.float32) / jnp.sqrt(Cin),
        w2=jax.random.normal(kw2, (3, 3, P, P), jnp.float32) / jnp.sqrt(9.0 * P),
        w3=jax.random.normal(kw3, (P, 4 * P), jnp.float32) / jnp.sqrt(P),
        # BatchNorm (eval-mode) params: affine + running statistics.
        bn1=_make_bn(kb1, P),
        bn2=_make_bn(kb2, P),
        bn3=_make_bn(kb3, 4 * P),
    )

    out = jax.block_until_ready(bottleneck_forward(x, params))
    assert out.shape == (N, Cin, H, W)

    ref = jax.block_until_ready(reference(x, params))
    # Loose tolerance: bf16 matmul operands (f32 accumulation) and bf16 output.
    assert jnp.allclose(out, ref, atol=5e-2, rtol=5e-2), "mismatch vs JAX reference"

    print("KERNEL_OK")
</pallas_src>

<mosaic_0001>
module attributes {stable_mosaic.version = 11 : i64} {
  func.func @bottleneck_kernel(%arg0: i32, %arg1: memref<1x64x32xbf16, #tpu.memory_space<vmem>>, %arg2: memref<32x8xbf16, #tpu.memory_space<vmem>>, %arg3: memref<3x24x8xbf16, #tpu.memory_space<vmem>>, %arg4: memref<8x32xbf16, #tpu.memory_space<vmem>>, %arg5: memref<6x32xf32, #tpu.memory_space<vmem>>, %arg6: memref<1x64x32xbf16, #tpu.memory_space<vmem>>, %arg7: memref<1x10x16x8xbf16, #tpu.memory_space<vmem>>, %arg8: memref<64x24xbf16, #tpu.memory_space<vmem>>) attributes {dimension_semantics = [#tpu.dimension_semantics<parallel>], iteration_bounds = array<i64: 2>, scalar_prefetch = 0 : i64, scratch_operands = 2 : i64, tpu.core_type = #tpu.core_type<tc>, window_params = [{transform_indices = @transform_0, window_bounds = array<i64: 1, 64, 32>}, {pipeline_mode = #tpu.pipeline_mode<synchronous>, transform_indices = @transform_1, window_bounds = array<i64: 32, 8>}, {pipeline_mode = #tpu.pipeline_mode<synchronous>, transform_indices = @transform_2, window_bounds = array<i64: 3, 24, 8>}, {pipeline_mode = #tpu.pipeline_mode<synchronous>, transform_indices = @transform_3, window_bounds = array<i64: 8, 32>}, {pipeline_mode = #tpu.pipeline_mode<synchronous>, transform_indices = @transform_4, window_bounds = array<i64: 6, 32>}, {transform_indices = @transform_5, window_bounds = array<i64: 1, 64, 32>}]} {
    %c0 = arith.constant 0 : index
    %c0_0 = arith.constant 0 : index
    %0 = vector.load %arg5[%c0, %c0_0] : memref<6x32xf32, #tpu.memory_space<vmem>>, vector<1x8xf32>
    %c1 = arith.constant 1 : index
    %c0_1 = arith.constant 0 : index
    %1 = vector.load %arg5[%c1, %c0_1] : memref<6x32xf32, #tpu.memory_space<vmem>>, vector<1x8xf32>
    %c2 = arith.constant 2 : index
    %c0_2 = arith.constant 0 : index
    %2 = vector.load %arg5[%c2, %c0_2] : memref<6x32xf32, #tpu.memory_space<vmem>>, vector<1x8xf32>
    %c3 = arith.constant 3 : index
    %c0_3 = arith.constant 0 : index
    %3 = vector.load %arg5[%c3, %c0_3] : memref<6x32xf32, #tpu.memory_space<vmem>>, vector<1x8xf32>
    %c4 = arith.constant 4 : index
    %c0_4 = arith.constant 0 : index
    %4 = vector.load %arg5[%c4, %c0_4] : memref<6x32xf32, #tpu.memory_space<vmem>>, vector<1x32xf32>
    %c5 = arith.constant 5 : index
    %c0_5 = arith.constant 0 : index
    %5 = vector.load %arg5[%c5, %c0_5] : memref<6x32xf32, #tpu.memory_space<vmem>>, vector<1x32xf32>
    %c0_6 = arith.constant 0 : index
    %c0_7 = arith.constant 0 : index
    %c0_8 = arith.constant 0 : index
    %6 = vector.load %arg1[%c0_6, %c0_7, %c0_8] : memref<1x64x32xbf16, #tpu.memory_space<vmem>>, vector<1x64x32xbf16>
    %7 = vector.shape_cast %6 : vector<1x64x32xbf16> to vector<64x32xbf16>
    %c0_9 = arith.constant 0 : index
    %c0_10 = arith.constant 0 : index
    %8 = vector.load %arg2[%c0_9, %c0_10] : memref<32x8xbf16, #tpu.memory_space<vmem>>, vector<32x8xbf16>
    %cst = arith.constant dense<0.000000e+00> : vector<64x8xf32>
    %9 = tpu.matmul %7, %8, %cst {dimension_numbers = #tpu.dot_dimension_numbers<[1], [0], [0], [1], [0, 0, 1, 1], [], []>} : vector<64x32xbf16>, vector<32x8xbf16>, vector<64x8xf32> -> vector<64x8xf32>
    %10 = vector.broadcast %0 : vector<1x8xf32> to vector<64x8xf32>
    %11 = arith.mulf %9, %10 : vector<64x8xf32>
    %12 = vector.broadcast %1 : vector<1x8xf32> to vector<64x8xf32>
    %13 = arith.addf %11, %12 : vector<64x8xf32>
    %cst_11 = arith.constant 0.000000e+00 : f32
    %14 = vector.broadcast %cst_11 : f32 to vector<64x8xf32>
    %15 = arith.maximumf %13, %14 : vector<64x8xf32>
    %cst_12 = arith.constant 0.000000e+00 : bf16
    %16 = vector.broadcast %cst_12 : bf16 to vector<1x1x16x8xbf16>
    %c0_13 = arith.constant 0 : index
    %c0_14 = arith.constant 0 : index
    %c0_15 = arith.constant 0 : index
    %c0_16 = arith.constant 0 : index
    %17 = vector.load %arg7[%c0_13, %c0_14, %c0_15, %c0_16] : memref<1x10x16x8xbf16, #tpu.memory_space<vmem>>, vector<1x1x16x8xbf16>
    tpu.vector_store %arg7[%c0_13, %c0_14, %c0_15, %c0_16], %16 {strides = array<i32>} : memref<1x10x16x8xbf16, #tpu.memory_space<vmem>>, vector<1x1x16x8xbf16>,
    %c0_17 = arith.constant 0 : index
    %c9 = arith.constant 9 : index
    %c0_18 = arith.constant 0 : index
    %c0_19 = arith.constant 0 : index
    %18 = vector.load %arg7[%c0_17, %c9, %c0_18, %c0_19] : memref<1x10x16x8xbf16, #tpu.memory_space<vmem>>, vector<1x1x16x8xbf16>
    tpu.vector_store %arg7[%c0_17, %c9, %c0_18, %c0_19], %16 {strides = array<i32>} : memref<1x10x16x8xbf16, #tpu.memory_space<vmem>>, vector<1x1x16x8xbf16>,
    %cst_20 = arith.constant 0.000000e+00 : bf16
    %19 = vector.broadcast %cst_20 : bf16 to vector<1x8x1x8xbf16>
    %c0_21 = arith.constant 0 : index
    %c1_22 = arith.constant 1 : index
    %c0_23 = arith.constant 0 : index
    %c0_24 = arith.constant 0 : index
    %20 = vector.load %arg7[%c0_21, %c1_22, %c0_23, %c0_24] : memref<1x10x16x8xbf16, #tpu.memory_space<vmem>>, vector<1x8x1x8xbf16>
    tpu.vector_store %arg7[%c0_21, %c1_22, %c0_23, %c0_24], %19 {strides = array<i32>} : memref<1x10x16x8xbf16, #tpu.memory_space<vmem>>, vector<1x8x1x8xbf16>,
    %cst_25 = arith.constant 0.000000e+00 : bf16
    %21 = vector.broadcast %cst_25 : bf16 to vector<1x8x7x8xbf16>
    %c0_26 = arith.constant 0 : index
    %c1_27 = arith.constant 1 : index
    %c9_28 = arith.constant 9 : index
    %c0_29 = arith.constant 0 : index
    %22 = vector.load %arg7[%c0_26, %c1_27, %c9_28, %c0_29] : memref<1x10x16x8xbf16, #tpu.memory_space<vmem>>, vector<1x8x7x8xbf16>
    tpu.vector_store %arg7[%c0_26, %c1_27, %c9_28, %c0_29], %21 {strides = array<i32>} : memref<1x10x16x8xbf16, #tpu.memory_space<vmem>>, vector<1x8x7x8xbf16>,
    %23 = arith.truncf %15 : vector<64x8xf32> to vector<64x8xbf16>
    %24 = vector.shape_cast %23 : vector<64x8xbf16> to vector<1x8x8x8xbf16>
    %c0_30 = arith.constant 0 : index
    %c1_31 = arith.constant 1 : index
    %c1_32 = arith.constant 1 : index
    %c0_33 = arith.constant 0 : index
    %25 = vector.load %arg7[%c0_30, %c1_31, %c1_32, %c0_33] : memref<1x10x16x8xbf16, #tpu.memory_space<vmem>>, vector<1x8x8x8xbf16>
    tpu.vector_store %arg7[%c0_30, %c1_31, %c1_32, %c0_33], %24 {strides = array<i32>} : memref<1x10x16x8xbf16, #tpu.memory_space<vmem>>, vector<1x8x8x8xbf16>,
    %cst_34 = arith.constant 0.000000e+00 : f32
    %26 = vector.broadcast %cst_34 : f32 to vector<64x8xf32>
    %c0_35 = arith.constant 0 : index
    %c0_36 = arith.constant 0 : index
    %c0_37 = arith.constant 0 : index
    %c0_38 = arith.constant 0 : index
    %27 = vector.load %arg7[%c0_35, %c0_36, %c0_37, %c0_38] : memref<1x10x16x8xbf16, #tpu.memory_space<vmem>>, vector<1x8x8x8xbf16>
    %28 = vector.shape_cast %27 : vector<1x8x8x8xbf16> to vector<64x8xbf16>
    %c0_39 = arith.constant 0 : index
    %c0_40 = arith.constant 0 : index
    %29 = vector.load %arg8[%c0_39, %c0_40] : memref<64x24xbf16, #tpu.memory_space<vmem>>, vector<64x8xbf16>
    tpu.vector_store %arg8[%c0_39, %c0_40], %28 {strides = array<i32>} : memref<64x24xbf16, #tpu.memory_space<vmem>>, vector<64x8xbf16>,
    %c0_41 = arith.constant 0 : index
    %c0_42 = arith.constant 0 : index
    %c1_43 = arith.constant 1 : index
    %c0_44 = arith.constant 0 : index
    %30 = vector.load %arg7[%c0_41, %c0_42, %c1_43, %c0_44] : memref<1x10x16x8xbf16, #tpu.memory_space<vmem>>, vector<1x8x8x8xbf16>
    %31 = vector.shape_cast %30 : vector<1x8x8x8xbf16> to vector<64x8xbf16>
    %c0_45 = arith.constant 0 : index
    %c8 = arith.constant 8 : index
    %32 = vector.load %arg8[%c0_45, %c8] : memref<64x24xbf16, #tpu.memory_space<vmem>>, vector<64x8xbf16>
    tpu.vector_store %arg8[%c0_45, %c8], %31 {strides = array<i32>} : memref<64x24xbf16, #tpu.memory_space<vmem>>, vector<64x8xbf16>,
    %c0_46 = arith.constant 0 : index
    %c0_47 = arith.constant 0 : index
    %c2_48 = arith.constant 2 : index
    %c0_49 = arith.constant 0 : index
    %33 = vector.load %arg7[%c0_46, %c0_47, %c2_48, %c0_49] : memref<1x10x16x8xbf16, #tpu.memory_space<vmem>>, vector<1x8x8x8xbf16>
    %34 = vector.shape_cast %33 : vector<1x8x8x8xbf16> to vector<64x8xbf16>
    %c0_50 = arith.constant 0 : index
    %c16 = arith.constant 16 : index
    %35 = vector.load %arg8[%c0_50, %c16] : memref<64x24xbf16, #tpu.memory_space<vmem>>, vector<64x8xbf16>
    tpu.vector_store %arg8[%c0_50, %c16], %34 {strides = array<i32>} : memref<64x24xbf16, #tpu.memory_space<vmem>>, vector<64x8xbf16>,
    %c0_51 = arith.constant 0 : index
    %c0_52 = arith.constant 0 : index
    %36 = vector.load %arg8[%c0_51, %c0_52] : memref<64x24xbf16, #tpu.memory_space<vmem>>, vector<64x24xbf16>
    %c0_53 = arith.constant 0 : index
    %c0_54 = arith.constant 0 : index
    %c0_55 = arith.constant 0 : index
    %37 = vector.load %arg3[%c0_53, %c0_54, %c0_55] : memref<3x24x8xbf16, #tpu.memory_space<vmem>>, vector<1x24x8xbf16>
    %38 = vector.shape_cast %37 : vector<1x24x8xbf16> to vector<24x8xbf16>
    %cst_56 = arith.constant dense<0.000000e+00> : vector<64x8xf32>
    %39 = tpu.matmul %36, %38, %cst_56 {dimension_numbers = #tpu.dot_dimension_numbers<[1], [0], [0], [1], [0, 0, 1, 1], [], []>} : vector<64x24xbf16>, vector<24x8xbf16>, vector<64x8xf32> -> vector<64x8xf32>
    %40 = arith.addf %26, %39 : vector<64x8xf32>
    %c0_57 = arith.constant 0 : index
    %c1_58 = arith.constant 1 : index
    %c0_59 = arith.constant 0 : index
    %c0_60 = arith.constant 0 : index
    %41 = vector.load %arg7[%c0_57, %c1_58, %c0_59, %c0_60] : memref<1x10x16x8xbf16, #tpu.memory_space<vmem>>, vector<1x8x8x8xbf16>
    %42 = vector.shape_cast %41 : vector<1x8x8x8xbf16> to vector<64x8xbf16>
    %c0_61 = arith.constant 0 : index
    %c0_62 = arith.constant 0 : index
    %43 = vector.load %arg8[%c0_61, %c0_62] : memref<64x24xbf16, #tpu.memory_space<vmem>>, vector<64x8xbf16>
    tpu.vector_store %arg8[%c0_61, %c0_62], %42 {strides = array<i32>} : memref<64x24xbf16, #tpu.memory_space<vmem>>, vector<64x8xbf16>,
    %c0_63 = arith.constant 0 : index
    %c1_64 = arith.constant 1 : index
    %c1_65 = arith.constant 1 : index
    %c0_66 = arith.constant 0 : index
    %44 = vector.load %arg7[%c0_63, %c1_64, %c1_65, %c0_66] : memref<1x10x16x8xbf16, #tpu.memory_space<vmem>>, vector<1x8x8x8xbf16>
    %45 = vector.shape_cast %44 : vector<1x8x8x8xbf16> to vector<64x8xbf16>
    %c0_67 = arith.constant 0 : index
    %c8_68 = arith.constant 8 : index
    %46 = vector.load %arg8[%c0_67, %c8_68] : memref<64x24xbf16, #tpu.memory_space<vmem>>, vector<64x8xbf16>
    tpu.vector_store %arg8[%c0_67, %c8_68], %45 {strides = array<i32>} : memref<64x24xbf16, #tpu.memory_space<vmem>>, vector<64x8xbf16>,
    %c0_69 = arith.constant 0 : index
    %c1_70 = arith.constant 1 : index
    %c2_71 = arith.constant 2 : index
    %c0_72 = arith.constant 0 : index
    %47 = vector.load %arg7[%c0_69, %c1_70, %c2_71, %c0_72] : memref<1x10x16x8xbf16, #tpu.memory_space<vmem>>, vector<1x8x8x8xbf16>
    %48 = vector.shape_cast %47 : vector<1x8x8x8xbf16> to vector<64x8xbf16>
    %c0_73 = arith.constant 0 : index
    %c16_74 = arith.constant 16 : index
    %49 = vector.load %arg8[%c0_73, %c16_74] : memref<64x24xbf16, #tpu.memory_space<vmem>>, vector<64x8xbf16>
    tpu.vector_store %arg8[%c0_73, %c16_74], %48 {strides = array<i32>} : memref<64x24xbf16, #tpu.memory_space<vmem>>, vector<64x8xbf16>,
    %c0_75 = arith.constant 0 : index
    %c0_76 = arith.constant 0 : index
    %50 = vector.load %arg8[%c0_75, %c0_76] : memref<64x24xbf16, #tpu.memory_space<vmem>>, vector<64x24xbf16>
    %c1_77 = arith.constant 1 : index
    %c0_78 = arith.constant 0 : index
    %c0_79 = arith.constant 0 : index
    %51 = vector.load %arg3[%c1_77, %c0_78, %c0_79] : memref<3x24x8xbf16, #tpu.memory_space<vmem>>, vector<1x24x8xbf16>
    %52 = vector.shape_cast %51 : vector<1x24x8xbf16> to vector<24x8xbf16>
    %cst_80 = arith.constant dense<0.000000e+00> : vector<64x8xf32>
    %53 = tpu.matmul %50, %52, %cst_80 {dimension_numbers = #tpu.dot_dimension_numbers<[1], [0], [0], [1], [0, 0, 1, 1], [], []>} : vector<64x24xbf16>, vector<24x8xbf16>, vector<64x8xf32> -> vector<64x8xf32>
    %54 = arith.addf %40, %53 : vector<64x8xf32>
    %c0_81 = arith.constant 0 : index
    %c2_82 = arith.constant 2 : index
    %c0_83 = arith.constant 0 : index
    %c0_84 = arith.constant 0 : index
    %55 = vector.load %arg7[%c0_81, %c2_82, %c0_83, %c0_84] : memref<1x10x16x8xbf16, #tpu.memory_space<vmem>>, vector<1x8x8x8xbf16>
    %56 = vector.shape_cast %55 : vector<1x8x8x8xbf16> to vector<64x8xbf16>
    %c0_85 = arith.constant 0 : index
    %c0_86 = arith.constant 0 : index
    %57 = vector.load %arg8[%c0_85, %c0_86] : memref<64x24xbf16, #tpu.memory_space<vmem>>, vector<64x8xbf16>
    tpu.vector_store %arg8[%c0_85, %c0_86], %56 {strides = array<i32>} : memref<64x24xbf16, #tpu.memory_space<vmem>>, vector<64x8xbf16>,
    %c0_87 = arith.constant 0 : index
    %c2_88 = arith.constant 2 : index
    %c1_89 = arith.constant 1 : index
    %c0_90 = arith.constant 0 : index
    %58 = vector.load %arg7[%c0_87, %c2_88, %c1_89, %c0_90] : memref<1x10x16x8xbf16, #tpu.memory_space<vmem>>, vector<1x8x8x8xbf16>
    %59 = vector.shape_cast %58 : vector<1x8x8x8xbf16> to vector<64x8xbf16>
    %c0_91 = arith.constant 0 : index
    %c8_92 = arith.constant 8 : index
    %60 = vector.load %arg8[%c0_91, %c8_92] : memref<64x24xbf16, #tpu.memory_space<vmem>>, vector<64x8xbf16>
    tpu.vector_store %arg8[%c0_91, %c8_92], %59 {strides = array<i32>} : memref<64x24xbf16, #tpu.memory_space<vmem>>, vector<64x8xbf16>,
    %c0_93 = arith.constant 0 : index
    %c2_94 = arith.constant 2 : index
    %c2_95 = arith.constant 2 : index
    %c0_96 = arith.constant 0 : index
    %61 = vector.load %arg7[%c0_93, %c2_94, %c2_95, %c0_96] : memref<1x10x16x8xbf16, #tpu.memory_space<vmem>>, vector<1x8x8x8xbf16>
    %62 = vector.shape_cast %61 : vector<1x8x8x8xbf16> to vector<64x8xbf16>
    %c0_97 = arith.constant 0 : index
    %c16_98 = arith.constant 16 : index
    %63 = vector.load %arg8[%c0_97, %c16_98] : memref<64x24xbf16, #tpu.memory_space<vmem>>, vector<64x8xbf16>
    tpu.vector_store %arg8[%c0_97, %c16_98], %62 {strides = array<i32>} : memref<64x24xbf16, #tpu.memory_space<vmem>>, vector<64x8xbf16>,
    %c0_99 = arith.constant 0 : index
    %c0_100 = arith.constant 0 : index
    %64 = vector.load %arg8[%c0_99, %c0_100] : memref<64x24xbf16, #tpu.memory_space<vmem>>, vector<64x24xbf16>
    %c2_101 = arith.constant 2 : index
    %c0_102 = arith.constant 0 : index
    %c0_103 = arith.constant 0 : index
    %65 = vector.load %arg3[%c2_101, %c0_102, %c0_103] : memref<3x24x8xbf16, #tpu.memory_space<vmem>>, vector<1x24x8xbf16>
    %66 = vector.shape_cast %65 : vector<1x24x8xbf16> to vector<24x8xbf16>
    %cst_104 = arith.constant dense<0.000000e+00> : vector<64x8xf32>
    %67 = tpu.matmul %64, %66, %cst_104 {dimension_numbers = #tpu.dot_dimension_numbers<[1], [0], [0], [1], [0, 0, 1, 1], [], []>} : vector<64x24xbf16>, vector<24x8xbf16>, vector<64x8xf32> -> vector<64x8xf32>
    %68 = arith.addf %54, %67 : vector<64x8xf32>
    %69 = vector.broadcast %2 : vector<1x8xf32> to vector<64x8xf32>
    %70 = arith.mulf %68, %69 : vector<64x8xf32>
    %71 = vector.broadcast %3 : vector<1x8xf32> to vector<64x8xf32>
    %72 = arith.addf %70, %71 : vector<64x8xf32>
    %cst_105 = arith.constant 0.000000e+00 : f32
    %73 = vector.broadcast %cst_105 : f32 to vector<64x8xf32>
    %74 = arith.maximumf %72, %73 : vector<64x8xf32>
    %75 = arith.truncf %74 : vector<64x8xf32> to vector<64x8xbf16>
    %c0_106 = arith.constant 0 : index
    %c0_107 = arith.constant 0 : index
    %76 = vector.load %arg4[%c0_106, %c0_107] : memref<8x32xbf16, #tpu.memory_space<vmem>>, vector<8x32xbf16>
    %cst_108 = arith.constant dense<0.000000e+00> : vector<64x32xf32>
    %77 = tpu.matmul %75, %76, %cst_108 {dimension_numbers = #tpu.dot_dimension_numbers<[1], [0], [0], [1], [0, 0, 1, 1], [], []>} : vector<64x8xbf16>, vector<8x32xbf16>, vector<64x32xf32> -> vector<64x32xf32>
    %78 = vector.broadcast %4 : vector<1x32xf32> to vector<64x32xf32>
    %79 = arith.mulf %77, %78 : vector<64x32xf32>
    %80 = vector.broadcast %5 : vector<1x32xf32> to vector<64x32xf32>
    %81 = arith.addf %79, %80 : vector<64x32xf32>
    %c0_109 = arith.constant 0 : index
    %c0_110 = arith.constant 0 : index
    %c0_111 = arith.constant 0 : index
    %82 = vector.load %arg1[%c0_109, %c0_110, %c0_111] : memref<1x64x32xbf16, #tpu.memory_space<vmem>>, vector<1x64x32xbf16>
    %83 = vector.shape_cast %82 : vector<1x64x32xbf16> to vector<64x32xbf16>
    %84 = arith.extf %83 : vector<64x32xbf16> to vector<64x32xf32>
    %85 = arith.addf %81, %84 : vector<64x32xf32>
    %cst_112 = arith.constant 0.000000e+00 : f32
    %86 = vector.broadcast %cst_112 : f32 to vector<64x32xf32>
    %87 = arith.maximumf %85, %86 : vector<64x32xf32>
    %88 = arith.truncf %87 : vector<64x32xf32> to vector<64x32xbf16>
    %89 = vector.shape_cast %88 : vector<64x32xbf16> to vector<1x64x32xbf16>
    %c0_113 = arith.constant 0 : index
    %c0_114 = arith.constant 0 : index
    %c0_115 = arith.constant 0 : index
    %90 = vector.load %arg6[%c0_113, %c0_114, %c0_115] : memref<1x64x32xbf16, #tpu.memory_space<vmem>>, vector<1x64x32xbf16>
    tpu.vector_store %arg6[%c0_113, %c0_114, %c0_115], %89 {strides = array<i32>} : memref<1x64x32xbf16, #tpu.memory_space<vmem>>, vector<1x64x32xbf16>,
    return
  }
  func.func @transform_0(%arg0: i32) -> (i32, i32, i32) {
    %c0_i32 = arith.constant 0 : i32
    %c0_i32_0 = arith.constant 0 : i32
    %c0_i32_1 = arith.constant 0 : i32
    return %arg0, %c0_i32, %c0_i32_0 : i32, i32, i32
  }
  func.func @transform_1(%arg0: i32) -> (i32, i32) {
    %c0_i32 = arith.constant 0 : i32
    %c0_i32_0 = arith.constant 0 : i32
    %c0_i32_1 = arith.constant 0 : i32
    return %c0_i32, %c0_i32_0 : i32, i32
  }
  func.func @transform_2(%arg0: i32) -> (i32, i32, i32) {
    %c0_i32 = arith.constant 0 : i32
    %c0_i32_0 = arith.constant 0 : i32
    %c0_i32_1 = arith.constant 0 : i32
    %c0_i32_2 = arith.constant 0 : i32
    return %c0_i32, %c0_i32_0, %c0_i32_1 : i32, i32, i32
  }
  func.func @transform_3(%arg0: i32) -> (i32, i32) {
    %c0_i32 = arith.constant 0 : i32
    %c0_i32_0 = arith.constant 0 : i32
    %c0_i32_1 = arith.constant 0 : i32
    return %c0_i32, %c0_i32_0 : i32, i32
  }
  func.func @transform_4(%arg0: i32) -> (i32, i32) {
    %c0_i32 = arith.constant 0 : i32
    %c0_i32_0 = arith.constant 0 : i32
    %c0_i32_1 = arith.constant 0 : i32
    return %c0_i32, %c0_i32_0 : i32, i32
  }
  func.func @transform_5(%arg0: i32) -> (i32, i32, i32) {
    %c0_i32 = arith.constant 0 : i32
    %c0_i32_0 = arith.constant 0 : i32
    %c0_i32_1 = arith.constant 0 : i32
    return %arg0, %c0_i32, %c0_i32_0 : i32, i32, i32
  }
}

</mosaic_0001>

<bundles_post_ra>
// kernel: tpu_custom_call.1
= control target key start
LH: loop header
LB: loop body
LE: loop exit
PB: predicated region body
PF: predicated region fallthrough
CT: control target
= control target key end

     0   :  { %s2379_s18 = smov 0   ;;  %s2858_s0 = inlined_call_operand.vmem [shape: bf16[2,64,32], index: 0, kind: input, shape index: {}]   ;;  %s2859_s1 = inlined_call_operand.vmem [shape: bf16[32,8], index: 1, kind: input, shape index: {}]   ;;  %s2860_s2 = inlined_call_operand.vmem [shape: bf16[3,24,8], index: 2, kind: input, shape index: {}]   ;;  %s2861_s3 = inlined_call_operand.vmem [shape: bf16[8,32], index: 3, kind: input, shape index: {}]   ;;  %s2862_s4 = inlined_call_operand.vmem [shape: f32[6,32], index: 4, kind: input, shape index: {}]   ;;  %s2863_s5 = inlined_call_operand.vmem [shape: bf16[2,64,32], index: 5, kind: output, shape index: {}]  }
   0x1 LB: > { %s2066_s19 = sadd.s32 4294967295, %s2344_s18   ;;  %p2070_p0 = scmp.ge.s32.totalorder %s2344_s18, 1  ;;  %s2344_s18 = sphi %s2379_s18, %s15_s18  }
   0x2   : > { %p187_p1 = scmp.lt.s32.totalorder %s2344_s18, 3 }
   0x4   : > { %p188_p2 = pnand %p2070_p0, %p187_p1 }
   0x5   : > { %p215_p3 = scmp.lt.s32.totalorder (!%p188_p2), %s2066_s19, 1  ;;  %s2347_s28 = smov (!%p188_p2), 16  }
   0x6   : > { %191 = sbr.rel (%p188_p2) target bundleno = 876 (0x36c), region = 40  ;;  %s2348_s29 = smov (!%p188_p2), 8  }
   0xb   : > { %v2316_v0 = vld [vmem:[%s2859_s1 + $0x8] sm:$0xff]   ;;  %v2317_v1 = vld [vmem:[%s2859_s1] sm:$0xff]   ;;  %s2873_s19 = smov (!%p215_p3, %s2066_s19), 1  ;;  %vm386_vm0 = vcmask 60416   ;;  %vm811_vm1 = vcmask 1042432   ;;  %vm812_vm2 = vcmask 1046532  }
   0xc   : > { %2239 = vmatprep.subr.bf16.mxu0 %v2316_v0  ;;  %2297 = vmatprep.subr.bf16.mxu1 %v2316_v0  ;;  %v2346_v2 = vmov 0   ;;  %s2173_s24 = sshll.u32 %s2873_s19, 5  ;;  %vm276_vm3 = vcmask 261120   ;;  %vm2400_vm4 = vmor %vm811_vm1, %vm812_vm2  ;;  %vm631_vm5 = vsmask.f32 3328  ;;  %vm393_vm8 = vcmask 57344  }
   0xd   : > { %2240 = vmatpush3.bf16.msra.mxu0 %v2316_v0  ;;  %2299 = vmatpush3.bf16.msra.mxu1 %v2316_v0  ;;  %387 = vst.msk [vmem:[#allocation2] sm:$0xf] %vm386_vm0, %v2346_v2  ;;  %388 = vst.msk [vmem:[#allocation2 + $0x4] sm:$0xf] %vm386_vm0, %v2346_v2  ;;  %s2409_s27 = scalar_lea.vmem %s2858_s0, %s2173_s24  ;;  %vm632_vm6 = vsmask.f32 7440  ;;  %s2837_s12 = scalar_lea.vmem %s2863_s5, %s2173_s24 }
   0xe   : > { %390 = vst.msk [vmem:[#allocation2 + $0x48] sm:$0xf] %vm386_vm0, %v2346_v2  ;;  %391 = vst.msk [vmem:[#allocation2 + $0x4c] sm:$0xf] %vm386_vm0, %v2346_v2  ;;  %2241 = vmatprep.subr.bf16.mxu0 %v2317_v1  ;;  %2298 = vmatprep.subr.bf16.mxu1 %v2317_v1  ;;  %v2318_v4 = vld [vmem:[%s2409_s27] sm:$0xff]   ;;  %v2319_v5 = vld [vmem:[%s2409_s27 + $0x10] sm:$0xff]  }
   0xf   : > { %2243 = vmatprep.mubr.msk.bf16.mxu0 %vm276_vm3, %v2318_v4  ;;  %v2320_v6 = vld [vmem:[%s2409_s27 + $0x8] sm:$0xff]   ;;  %2247 = vmatprep.mubr.msk.bf16.mxu1 %vm276_vm3, %v2319_v5  ;;  %v2321_v7 = vld [vmem:[%s2409_s27 + $0x18] sm:$0xff]   ;;  %vm2424_vm7 = vmor %vm631_vm5, %vm632_vm6  ;;  %vm394_vm9 = vsmask.f32 256  ;;  %vm421_vm11 = vsmask.f32 7938 }
  0x10   : > { %v402_v25 = vld [vmem:[#allocation2 + $0x18] sm:$0x1]  ;;  %vm2431_vm10 = vmand %vm393_vm8, %vm394_vm9  ;;  %v429_v27 = vld [vmem:[#allocation2 + $0x1c] sm:$0xf]  ;;  %vm770_vm13 = vcmask 126016   ;;  %vm870_vm14 = vcmask 191616  }
  0x11   : > { %2242 = vmatpush3.bf16.msra.mxu0 %v2317_v1  ;;  %2300 = vmatpush3.bf16.msra.mxu1 %v2317_v1  ;;  %v414_v28 = vld [vmem:[#allocation2 + $0x38] sm:$0x1]  ;;  %v403_v29 = vsel %vm2431_vm10, 0, %v402_v25  ;;  %vm2438_vm12 = vmand %vm386_vm0, %vm421_vm11  ;;  %v441_v33 = vld [vmem:[#allocation2 + $0x3c] sm:$0xf]  ;;  %vm1216_vm15 = vcmask 1043456  }
  0x12   : > { %v415_v31 = vsel %vm2431_vm10, 0, %v414_v28  ;;  %404 = vst [vmem:[#allocation2 + $0x18] sm:$0x1] %v403_v29  ;;  %v430_v32 = vsel %vm2438_vm12, 0, %v429_v27  ;;  %v396_v34 = vld [vmem:[#allocation2 + $0x8] sm:$0x1] }
  0x13   : > { %416 = vst [vmem:[#allocation2 + $0x38] sm:$0x1] %v415_v31  ;;  %431 = vst [vmem:[#allocation2 + $0x1c] sm:$0xf] %v430_v32  ;;  %v442_v35 = vsel %vm2438_vm12, 0, %v441_v33  ;;  %v397_v36 = vsel %vm2431_vm10, 0, %v396_v34 }
  0x14   : > { %2244 = vmatmul.mubr.msk.bf16.vlgmr.msra.gmra.mxu0 %vm276_vm3, %v2320_v6  ;;  %v779_v8 = vld [vmem:[#allocation2] sm:$0xe]  ;;  %v780_v9 = vld [vmem:[#allocation2 + $0x4] sm:$0x1]  ;;  %2248 = vmatmul.mubr.msk.bf16.vlgmr.msra.gmra.mxu1 %vm276_vm3, %v2321_v7  ;;  %v423_v37 = vld [vmem:[#allocation2 + $0xc] sm:$0xf] }
  0x15   : > { %v615_v10 = vld [vmem:[#allocation2] sm:$0xf]  ;;  %v2095_v11 = vrot.slane %v779_v8, 9  ;;  %v816_v12 = vrot.slane %v780_v9, 5  ;;  %v616_v13 = vld [vmem:[#allocation2 + $0x4] sm:$0x1] }
  0x16   : > { %v635_v14 = vshrl.u32 %v615_v10, 16  ;;  %v638_v15 = vshll.u32 %v615_v10, 16  ;;  %v644_v16 = vshll.u32 %v616_v13, 16  ;;  %v408_v38 = vld [vmem:[#allocation2 + $0x28] sm:$0x1]  ;;  %v424_v39 = vsel %vm2438_vm12, 0, %v423_v37 }
  0x17   : > { %v817_v17 = vsel %vm2400_vm4, %v2095_v11, %v816_v12  ;;  %443 = vst [vmem:[#allocation2 + $0x3c] sm:$0xf] %v442_v35  ;;  %398 = vst [vmem:[#allocation2 + $0x8] sm:$0x1] %v397_v36  ;;  %v409_v40 = vsel %vm2431_vm10, 0, %v408_v38  ;;  %vm1203_vm1 = vcmask 195584  }
  0x18   : > { %v637_v18 = vrot.slane %v635_v14, 4  ;;  %v640_v19 = vrot.slane %v638_v15, 5  ;;  %846 = vrot.lane.b32.xlu0 %v817_v17, %s2347_s28  ;;  %v646_v21 = vrot.slane %v644_v16, 5  ;;  %v435_v41 = vld [vmem:[#allocation2 + $0x2c] sm:$0xf]  ;;  %vm2002_vm2 = vcmask 257024  }
  0x19   : > { %v405_v42 = vld [vmem:[#allocation2 + $0x20] sm:$0x1]  ;;  %425 = vst [vmem:[#allocation2 + $0xc] sm:$0xf] %v424_v39  ;;  %410 = vst [vmem:[#allocation2 + $0x28] sm:$0x1] %v409_v40 }
  0x1a   : > { %v641_v20 = vor.u32 %v640_v19, %v637_v18  ;;  %v436_v43 = vsel %vm2438_vm12, 0, %v435_v41  ;;  %v406_v44 = vsel %vm2431_vm10, 0, %v405_v42  ;;  %v432_v45 = vld [vmem:[#allocation2 + $0x24] sm:$0xf]  ;;  %v417_v46 = vld [vmem:[#allocation2 + $0x40] sm:$0x1] }
  0x1b   : > { %437 = vst [vmem:[#allocation2 + $0x2c] sm:$0xf] %v436_v43  ;;  %407 = vst [vmem:[#allocation2 + $0x20] sm:$0x1] %v406_v44  ;;  %v433_v47 = vsel %vm2438_vm12, 0, %v432_v45  ;;  %v418_v48 = vsel %vm2431_vm10, 0, %v417_v46 }
  0x1c   : > { %v642_v23 = vrot.slane %v641_v20, 4  ;;  %v444_v49 = vld [vmem:[#allocation2 + $0x44] sm:$0xf]  ;;  %434 = vst [vmem:[#allocation2 + $0x24] sm:$0xf] %v433_v47 }
  0x1d   : > { %419 = vst [vmem:[#allocation2 + $0x40] sm:$0x1] %v418_v48  ;;  %v445_v50 = vsel %vm2438_vm12, 0, %v444_v49  ;;  %v399_v51 = vld [vmem:[#allocation2 + $0x10] sm:$0x1] }
  0x1e   : > { %v647_v24 = vsel %vm2424_vm7, %v642_v23, %v646_v21  ;;  %446 = vst [vmem:[#allocation2 + $0x44] sm:$0xf] %v445_v50  ;;  %v426_v52 = vld [vmem:[#allocation2 + $0x14] sm:$0xf]  ;;  %v400_v53 = vsel %vm2431_vm10, 0, %v399_v51 }
  0x1f   : > { %746 = vrot.lane.b32.xlu0 %v647_v24, %s2348_s29  ;;  %v427_v54 = vsel %vm2438_vm12, 0, %v426_v52  ;;  %401 = vst [vmem:[#allocation2 + $0x10] sm:$0x1] %v400_v53  ;;  %v411_v55 = vld [vmem:[#allocation2 + $0x30] sm:$0x1] }
  0x20   : > { %428 = vst [vmem:[#allocation2 + $0x14] sm:$0xf] %v427_v54  ;;  %v438_v56 = vld [vmem:[#allocation2 + $0x34] sm:$0xf]  ;;  %v412_v57 = vsel %vm2431_vm10, 0, %v411_v55 }
  0x21   : > { %v439_v58 = vsel %vm2438_vm12, 0, %v438_v56  ;;  %413 = vst [vmem:[#allocation2 + $0x30] sm:$0x1] %v412_v57  ;;  %v599_v59 = vld [vmem:[#allocation2] sm:$0xf] }
  0x22   : > { %440 = vst [vmem:[#allocation2 + $0x34] sm:$0xf] %v439_v58  ;;  %607 = vst.msk [vmem:[#allocation3] sm:$0xf] %vm386_vm0, %v599_v59  ;;  %v2085_v62 = vld [vmem:[%s2862_s4] ss:$0 sm:$0xff] }
  0x23   : > { %v2481_v63 = vld [vmem:[%s2862_s4 + $0x1] ss:$0 sm:$0xff]  ;;  %v563_v36 = vld [vmem:[#allocation2 + $0x18] sm:$0xf]  ;;  %v566_v42 = vld [vmem:[#allocation2 + $0x1c] sm:$0x1] }
  0x24   : > { %v587_v43 = vld [vmem:[#allocation2 + $0x38] sm:$0xf]  ;;  %v590_v48 = vld [vmem:[#allocation2 + $0x3c] sm:$0x1]  ;;  %v551_v55 = vld [vmem:[#allocation2 + $0x8] sm:$0xf] }
  0x25   : > { %v554_v59 = vld [vmem:[#allocation2 + $0xc] sm:$0x1] }
  0x8a   : > { %v847_v60 = vpop.permute.xlu0 %846 }
  0x91   : > { %v747_v61 = vpop.permute.xlu0 %746 }
  0x92   : > { %771 = vst.msk [vmem:[#allocation3] sm:$0xf] %vm770_vm13, %v747_v61 }
  0x93   : > { %871 = vst.msk [vmem:[#allocation3] sm:$0xf] %vm870_vm14, %v847_v60 }
  0xd4   : > { %v2245_v0 = vpop.f32.mrf.mxu0  ;;  %v2249_v2 = vpop.f32.mrf.mxu1 }
  0xd5   : > { %v360_v1 = vmul.f32 %v2245_v0, %v2085_v62  ;;  %v364_v4 = vmul.f32 %v2249_v2, %v2085_v62 }
  0xd6   : > { %v323_v5 = vpop.f32.mrf.mxu0  ;;  %v339_v8 = vpop.f32.mrf.mxu1 }
  0xd7   : > { %v372_v6 = vadd.f32 %v2481_v63, %v360_v1  ;;  %v358_v7 = vmul.f32 %v2085_v62, %v323_v5  ;;  %v376_v9 = vadd.f32 %v2481_v63, %v364_v4  ;;  %v362_v10 = vmul.f32 %v2085_v62, %v339_v8  ;;  %v575_v4 = vld [vmem:[#allocation2 + $0x28] sm:$0xf]  ;;  %v578_v5 = vld [vmem:[#allocation2 + $0x2c] sm:$0x1] }
  0xd8   : > { %v2246_v11 = vpop.f32.mrf.mxu0  ;;  %v2250_v15 = vpop.f32.mrf.mxu1 }
  0xd9   : > { %v380_v12 = vmax.f32 %v372_v6, 0.0  ;;  %v370_v13 = vadd.f32 %v2481_v63, %v358_v7  ;;  %v361_v14 = vmul.f32 %v2246_v11, %v2085_v62  ;;  %v384_v16 = vmax.f32 %v376_v9, 0.0 }
  0xda   : > { %v374_v17 = vadd.f32 %v2481_v63, %v362_v10  ;;  %v365_v18 = vmul.f32 %v2250_v15, %v2085_v62  ;;  %v326_v19 = vpop.f32.mrf.mxu0  ;;  %v342_v25 = vpop.f32.mrf.mxu1 }
  0xdb   : > { %v2177_v20 = vpack.c.bf16 %v380_v12, %v380_v12  ;;  %v378_v21 = vmax.f32 %v370_v13, 0.0  ;;  %v373_v23 = vadd.f32 %v2481_v63, %v361_v14  ;;  %v359_v24 = vmul.f32 %v2085_v62, %v326_v19 }
  0xdc   : > { %v2181_v27 = vpack.c.bf16 %v384_v16, %v384_v16  ;;  %v382_v28 = vmax.f32 %v374_v17, 0.0  ;;  %v377_v29 = vadd.f32 %v2481_v63, %v365_v18  ;;  %v363_v31 = vmul.f32 %v2085_v62, %v342_v25  ;;  %v569_v16 = vld [vmem:[#allocation2 + $0x20] sm:$0xf]  ;;  %v572_v17 = vld [vmem:[#allocation2 + $0x24] sm:$0x1] }
  0xdd   : > { %v488_v32 = vshrl.u32 %v2177_v20, 16  ;;  %v491_v33 = vshll.u32 %v2177_v20, 16  ;;  %v2175_v34 = vpack.c.bf16 %v378_v21, %v378_v21  ;;  %v381_v35 = vmax.f32 %v373_v23, 0.0 }
  0xde   : > { %v520_v37 = vshrl.u32 %v2181_v27, 16  ;;  %v523_v38 = vshll.u32 %v2181_v27, 16  ;;  %v2179_v39 = vpack.c.bf16 %v382_v28, %v382_v28  ;;  %v385_v40 = vmax.f32 %v377_v29, 0.0  ;;  %v593_v27 = vld [vmem:[#allocation2 + $0x40] sm:$0xf] }
  0xdf   : > { %v490_v41 = vrot.slane %v488_v32, 7  ;;  %v472_v44 = vshrl.u32 %v2175_v34, 16  ;;  %v475_v45 = vshll.u32 %v2175_v34, 16  ;;  %v2178_v46 = vpack.c.bf16 %v381_v35, %v381_v35  ;;  %v596_v28 = vld [vmem:[#allocation2 + $0x44] sm:$0x1] }
  0xe0   : > { %v522_v47 = vrot.slane %v520_v37, 7  ;;  %v504_v49 = vshrl.u32 %v2179_v39, 16  ;;  %v507_v50 = vshll.u32 %v2179_v39, 16  ;;  %v2182_v51 = vpack.c.bf16 %v385_v40, %v385_v40 }
  0xe1   : > { %v493_v52 = vor.u32 %v491_v33, %v490_v41  ;;  %v494_v53 = vrot.slane %v490_v41, 4  ;;  %v474_v54 = vrot.slane %v472_v44, 7  ;;  %v496_v56 = vshrl.u32 %v2178_v46, 16  ;;  %v557_v44 = vld [vmem:[#allocation2 + $0x10] sm:$0xf] }
  0xe2   : > { %v525_v57 = vor.u32 %v523_v38, %v522_v47  ;;  %v526_v58 = vrot.slane %v522_v47, 4  ;;  %v506_v60 = vrot.slane %v504_v49, 7  ;;  %v499_v61 = vshll.u32 %v2178_v46, 16 }
  0xe3   : > { %v564_v62 = vsel %vm2438_vm12, %v493_v52, %v563_v36  ;;  %v567_v0 = vsel %vm2431_vm10, %v494_v53, %v566_v42  ;;  %v477_v1 = vor.u32 %v475_v45, %v474_v54  ;;  %v478_v2 = vrot.slane %v474_v54, 4  ;;  %v560_v45 = vld [vmem:[#allocation2 + $0x14] sm:$0x1] }
  0xe4   : > { %565 = vst [vmem:[#allocation2 + $0x18] sm:$0xf] %v564_v62  ;;  %568 = vst [vmem:[#allocation2 + $0x1c] sm:$0x1] %v567_v0  ;;  %v588_v6 = vsel %vm2438_vm12, %v525_v57, %v587_v43  ;;  %v591_v7 = vsel %vm2431_vm10, %v526_v58, %v590_v48  ;;  %v509_v8 = vor.u32 %v507_v50, %v506_v60  ;;  %v510_v9 = vrot.slane %v506_v60, 4 }
  0xe5   : > { %589 = vst [vmem:[#allocation2 + $0x38] sm:$0xf] %v588_v6  ;;  %592 = vst [vmem:[#allocation2 + $0x3c] sm:$0x1] %v591_v7  ;;  %v552_v10 = vsel %vm2438_vm12, %v477_v1, %v551_v55  ;;  %v555_v11 = vsel %vm2431_vm10, %v478_v2, %v554_v59  ;;  %v498_v12 = vrot.slane %v496_v56, 7  ;;  %v528_v13 = vshrl.u32 %v2182_v51, 16 }
  0xe6   : > { %553 = vst [vmem:[#allocation2 + $0x8] sm:$0xf] %v552_v10  ;;  %556 = vst [vmem:[#allocation2 + $0xc] sm:$0x1] %v555_v11  ;;  %v576_v14 = vsel %vm2438_vm12, %v509_v8, %v575_v4  ;;  %v579_v15 = vsel %vm2431_vm10, %v510_v9, %v578_v5  ;;  %v531_v18 = vshll.u32 %v2182_v51, 16  ;;  %v371_v19 = vadd.f32 %v2481_v63, %v359_v24 }
  0xe7   : > { %577 = vst [vmem:[#allocation2 + $0x28] sm:$0xf] %v576_v14  ;;  %580 = vst [vmem:[#allocation2 + $0x2c] sm:$0x1] %v579_v15  ;;  %v501_v20 = vor.u32 %v499_v61, %v498_v12  ;;  %v502_v21 = vrot.slane %v498_v12, 4  ;;  %v530_v23 = vrot.slane %v528_v13, 7  ;;  %v375_v25 = vadd.f32 %v2481_v63, %v363_v31 }
  0xe8   : > { %v379_v29 = vmax.f32 %v371_v19, 0.0  ;;  %v581_v56 = vld [vmem:[#allocation2 + $0x30] sm:$0xf]  ;;  %v584_v57 = vld [vmem:[#allocation2 + $0x34] sm:$0x1] }
  0xe9   : > { %v570_v32 = vsel %vm2438_vm12, %v501_v20, %v569_v16  ;;  %v573_v33 = vsel %vm2431_vm10, %v502_v21, %v572_v17  ;;  %v533_v34 = vor.u32 %v531_v18, %v530_v23  ;;  %v534_v35 = vrot.slane %v530_v23, 4 }
  0xea   : > { %571 = vst [vmem:[#allocation2 + $0x20] sm:$0xf] %v570_v32  ;;  %574 = vst [vmem:[#allocation2 + $0x24] sm:$0x1] %v573_v33  ;;  %v2176_v24 = vpack.c.bf16 %v379_v29, %v379_v29  ;;  %v383_v36 = vmax.f32 %v375_v25, 0.0 }
  0xeb   : > { %v594_v37 = vsel %vm2438_vm12, %v533_v34, %v593_v27  ;;  %v597_v63 = vsel %vm2431_vm10, %v534_v35, %v596_v28  ;;  %v1070_v31 = vld [vmem:[#allocation2 + $0x18] sm:$0xe]  ;;  %v1071_v38 = vld [vmem:[#allocation2 + $0x1c] sm:$0x1] }
  0xec   : > { %v785_v39 = vld [vmem:[#allocation2 + $0x18] sm:$0xe]  ;;  %595 = vst [vmem:[#allocation2 + $0x40] sm:$0xf] %v594_v37  ;;  %598 = vst [vmem:[#allocation2 + $0x44] sm:$0x1] %v597_v63  ;;  %v2180_v41 = vpack.c.bf16 %v383_v36, %v383_v36 }
  0xed   : > { %v480_v40 = vshrl.u32 %v2176_v24, 16  ;;  %v2105_v42 = vrot.slane %v1070_v31, 9  ;;  %v786_v43 = vld [vmem:[#allocation2 + $0x1c] sm:$0x1]  ;;  %v1108_v46 = vrot.slane %v1071_v38, 5  ;;  %v2098_v47 = vrot.slane %v785_v39, 9 }
  0xee   : > { %v828_v48 = vrot.slane %v786_v43, 5  ;;  %v1078_v49 = vld [vmem:[#allocation2 + $0x38] sm:$0xe]  ;;  %v483_v51 = vshll.u32 %v2176_v24, 16  ;;  %v512_v52 = vshrl.u32 %v2180_v41, 16  ;;  %v515_v55 = vshll.u32 %v2180_v41, 16 }
  0xef   : > { %v482_v50 = vrot.slane %v480_v40, 7  ;;  %v1079_v53 = vld [vmem:[#allocation2 + $0x3c] sm:$0x1]  ;;  %v2109_v54 = vrot.slane %v1078_v49, 9  ;;  %v1109_v58 = vsel %vm2400_vm4, %v2105_v42, %v1108_v46  ;;  %v793_v61 = vld [vmem:[#allocation2 + $0x38] sm:$0xe] }
  0xf0   : > { %v829_v59 = vsel %vm2400_vm4, %v2098_v47, %v828_v48  ;;  %v1124_v60 = vrot.slane %v1079_v53, 5  ;;  %v794_v62 = vld [vmem:[#allocation2 + $0x3c] sm:$0x1]  ;;  %v514_v2 = vrot.slane %v512_v52, 7  ;;  %1134 = vrot.lane.b32.xlu0 %v1109_v58, %s2347_s28  ;;  %v2102_v4 = vrot.slane %v793_v61, 9 }
  0xf1   : > { %v485_v0 = vor.u32 %v483_v51, %v482_v50  ;;  %v486_v1 = vrot.slane %v482_v50, 4  ;;  %852 = vrot.lane.b32.xlu1 %v829_v59, %s2347_s28  ;;  %v1066_v5 = vld [vmem:[#allocation2 + $0x8] sm:$0xe]  ;;  %v844_v7 = vrot.slane %v794_v62, 5  ;;  %v1067_v8 = vld [vmem:[#allocation2 + $0xc] sm:$0x1] }
  0xf2   : > { %v1125_v6 = vsel %vm2400_vm4, %v2109_v54, %v1124_v60  ;;  %v2103_v9 = vrot.slane %v1066_v5, 9  ;;  %v781_v10 = vld [vmem:[#allocation2 + $0x8] sm:$0xe]  ;;  %v517_v13 = vor.u32 %v515_v55, %v514_v2  ;;  %v518_v14 = vrot.slane %v514_v2, 4  ;;  %v782_v15 = vld [vmem:[#allocation2 + $0xc] sm:$0x1] }
  0xf3   : > { %v558_v11 = vsel %vm2438_vm12, %v485_v0, %v557_v44  ;;  %v561_v12 = vsel %vm2431_vm10, %v486_v1, %v560_v45  ;;  %v1074_v16 = vld [vmem:[#allocation2 + $0x28] sm:$0xe]  ;;  %v845_v17 = vsel %vm2400_vm4, %v2102_v4, %v844_v7  ;;  %v1100_v18 = vrot.slane %v1067_v8, 5  ;;  %v1075_v21 = vld [vmem:[#allocation2 + $0x2c] sm:$0x1] }
  0xf4   : > { %559 = vst [vmem:[#allocation2 + $0x10] sm:$0xf] %v558_v11  ;;  %562 = vst [vmem:[#allocation2 + $0x14] sm:$0x1] %v561_v12  ;;  %v2096_v19 = vrot.slane %v781_v10, 9  ;;  %v820_v20 = vrot.slane %v782_v15, 5  ;;  %v582_v23 = vsel %vm2438_vm12, %v517_v13, %v581_v56  ;;  %v585_v25 = vsel %vm2431_vm10, %v518_v14, %v584_v57  ;;  %1142 = vrot.lane.b32.xlu0 %v1125_v6, %s2347_s28 }
  0xf5   : > { %860 = vrot.lane.b32.xlu1 %v845_v17, %s2347_s28  ;;  %v789_v27 = vld [vmem:[#allocation2 + $0x28] sm:$0xe]  ;;  %v790_v28 = vld [vmem:[#allocation2 + $0x2c] sm:$0x1]  ;;  %583 = vst [vmem:[#allocation2 + $0x30] sm:$0xf] %v582_v23  ;;  %v1101_v30 = vsel %vm2400_vm4, %v2103_v9, %v1100_v18 }
  0xf6   : > { %586 = vst [vmem:[#allocation2 + $0x34] sm:$0x1] %v585_v25  ;;  %v1072_v29 = vld [vmem:[#allocation2 + $0x20] sm:$0xe]  ;;  %v1073_v32 = vld [vmem:[#allocation2 + $0x24] sm:$0x1]  ;;  %v821_v26 = vsel %vm2400_vm4, %v2096_v19, %v820_v20 }
  0xf7   : > { %v2107_v33 = vrot.slane %v1074_v16, 9  ;;  %v1116_v34 = vrot.slane %v1075_v21, 5  ;;  %v787_v35 = vld [vmem:[#allocation2 + $0x20] sm:$0xe]  ;;  %v788_v24 = vld [vmem:[#allocation2 + $0x24] sm:$0x1] }
  0xf8   : > { %v2100_v36 = vrot.slane %v789_v27, 9  ;;  %v836_v37 = vrot.slane %v790_v28, 5  ;;  %1130 = vrot.lane.b32.xlu0 %v1101_v30, %s2347_s28  ;;  %v2106_v63 = vrot.slane %v1072_v29, 9  ;;  %v1112_v31 = vrot.slane %v1073_v32, 5  ;;  %v621_v40 = vld [vmem:[#allocation2 + $0x18] sm:$0xf] }
  0xf9   : > { %848 = vrot.lane.b32.xlu1 %v821_v26, %s2347_s28  ;;  %v2099_v38 = vrot.slane %v787_v35, 9  ;;  %v832_v39 = vrot.slane %v788_v24, 5  ;;  %v1080_v41 = vld [vmem:[#allocation2 + $0x40] sm:$0xe]  ;;  %v677_v42 = vshrl.u32 %v621_v40, 16  ;;  %v680_v43 = vshll.u32 %v621_v40, 16 }
  0xfa   : > { %v629_v44 = vld [vmem:[#allocation2 + $0x38] sm:$0xf]  ;;  %v1081_v45 = vld [vmem:[#allocation2 + $0x44] sm:$0x1]  ;;  %v622_v46 = vld [vmem:[#allocation2 + $0x1c] sm:$0x1]  ;;  %v1117_v47 = vsel %vm2400_vm4, %v2107_v33, %v1116_v34  ;;  %v837_v48 = vsel %vm2400_vm4, %v2100_v36, %v836_v37  ;;  %v1113_v57 = vsel %vm2400_vm4, %v2106_v63, %v1112_v31 }
  0xfb   : > { %v783_v49 = vld [vmem:[#allocation2 + $0x10] sm:$0xe]  ;;  %v679_v50 = vrot.slane %v677_v42, 4  ;;  %v682_v51 = vrot.slane %v680_v43, 5  ;;  %v910_v52 = vld [vmem:[#allocation2 + $0x18] sm:$0xf]  ;;  %v833_v58 = vsel %vm2400_vm4, %v2099_v38, %v832_v39 }
  0xfc   : > { %1138 = vrot.lane.b32.xlu0 %v1117_v47, %s2347_s28  ;;  %v2110_v53 = vrot.slane %v1080_v41, 9  ;;  %v784_v54 = vld [vmem:[#allocation2 + $0x14] sm:$0x1]  ;;  %v630_v55 = vld [vmem:[#allocation2 + $0x3c] sm:$0x1]  ;;  %v733_v56 = vshrl.u32 %v629_v44, 16 }
  0xfd   : > { %856 = vrot.lane.b32.xlu1 %v837_v48, %s2347_s28  ;;  %v1128_v59 = vrot.slane %v1081_v45, 5  ;;  %v686_v60 = vshll.u32 %v622_v46, 16  ;;  %v791_v61 = vld [vmem:[#allocation2 + $0x30] sm:$0xe]  ;;  %v792_v62 = vld [vmem:[#allocation2 + $0x34] sm:$0x1]  ;;  %v683_v0 = vor.u32 %v682_v51, %v679_v50 }
  0xfe   : > { %v735_v1 = vrot.slane %v733_v56, 4  ;;  %v736_v2 = vshll.u32 %v629_v44, 16  ;;  %v911_v4 = vld [vmem:[#allocation2 + $0x1c] sm:$0x1]  ;;  %v951_v5 = vshrl.u32 %v910_v52, 16  ;;  %v2097_v6 = vrot.slane %v783_v49, 9 }
  0xff   : > { %v824_v7 = vrot.slane %v784_v54, 5  ;;  %v742_v8 = vshll.u32 %v630_v55, 16  ;;  %v954_v9 = vshll.u32 %v910_v52, 16  ;;  %v918_v10 = vld [vmem:[#allocation2 + $0x38] sm:$0xf]  ;;  %v2101_v11 = vrot.slane %v791_v61, 9 }
 0x100   : > { %854 = vrot.lane.b32.xlu0 %v833_v58, %s2347_s28  ;;  %v840_v12 = vrot.slane %v792_v62, 5  ;;  %v738_v13 = vrot.slane %v736_v2, 5  ;;  %v953_v14 = vrot.slane %v951_v5, 4  ;;  %v2553_v15 = vld [vmem:[#allocation2 + $0x10] sm:$0xe]  ;;  %v1129_v16 = vsel %vm2400_vm4, %v2110_v53, %v1128_v59 }
 0x101   : > { %1136 = vrot.lane.b32.xlu1 %v1113_v57, %s2347_s28  ;;  %v688_v17 = vrot.slane %v686_v60, 5  ;;  %v956_v18 = vrot.slane %v954_v9, 5  ;;  %v960_v19 = vshll.u32 %v911_v4, 16  ;;  %v684_v20 = vrot.slane %v683_v0, 4  ;;  %v919_v23 = vld [vmem:[#allocation2 + $0x3c] sm:$0x1] }
 0x102   : > { %v739_v21 = vor.u32 %v738_v13, %v735_v1  ;;  %v1007_v25 = vshrl.u32 %v918_v10, 16  ;;  %v1010_v27 = vshll.u32 %v918_v10, 16  ;;  %v825_v28 = vsel %vm2400_vm4, %v2097_v6, %v824_v7  ;;  %v1069_v33 = vld [vmem:[#allocation2 + $0x14] sm:$0x1]  ;;  %v617_v35 = vld [vmem:[#allocation2 + $0x8] sm:$0xf] }
 0x103   : > { %v744_v29 = vrot.slane %v742_v8, 5  ;;  %v957_v32 = vor.u32 %v956_v18, %v953_v14  ;;  %v2104_v34 = vrot.slane %v2553_v15, 9  ;;  %v841_v24 = vsel %vm2400_vm4, %v2101_v11, %v840_v12  ;;  %v2564_v36 = vld [vmem:[#allocation2 + $0x30] sm:$0xe]  ;;  %v1413_v37 = vld [vmem:[#allocation2 + $0x18] sm:$0xf] }
 0x104   : > { %850 = vrot.lane.b32.xlu0 %v825_v28, %s2347_s28  ;;  %v1009_v30 = vrot.slane %v1007_v25, 4  ;;  %v1012_v26 = vrot.slane %v1010_v27, 5  ;;  %v962_v63 = vrot.slane %v960_v19, 5  ;;  %v1016_v31 = vshll.u32 %v919_v23, 16  ;;  %v618_v38 = vld [vmem:[#allocation2 + $0xc] sm:$0x1] }
 0x105   : > { %1144 = vrot.lane.b32.xlu1 %v1129_v16, %s2347_s28  ;;  %v649_v39 = vshrl.u32 %v617_v35, 16  ;;  %v652_v40 = vshll.u32 %v617_v35, 16  ;;  %v689_v41 = vsel %vm2424_vm7, %v684_v20, %v688_v17  ;;  %v740_v42 = vrot.slane %v739_v21, 4  ;;  %v1414_v44 = vld [vmem:[#allocation2 + $0x1c] sm:$0x1] }
 0x106   : > { %v1013_v43 = vor.u32 %v1012_v26, %v1009_v30  ;;  %v1442_v45 = vshrl.u32 %v1413_v37, 16  ;;  %v906_v46 = vld [vmem:[#allocation2 + $0x8] sm:$0xf]  ;;  %v958_v47 = vrot.slane %v957_v32, 4  ;;  %v1445_v50 = vshll.u32 %v1413_v37, 16 }
 0x107   : > { %v651_v48 = vrot.slane %v649_v39, 4  ;;  %v654_v49 = vrot.slane %v652_v40, 5  ;;  %v625_v51 = vld [vmem:[#allocation2 + $0x28] sm:$0xf]  ;;  %v1104_v52 = vrot.slane %v1069_v33, 5  ;;  %v2108_v53 = vrot.slane %v2564_v36, 9 }
 0x108   : > { %858 = vrot.lane.b32.xlu0 %v841_v24, %s2347_s28  ;;  %v658_v54 = vshll.u32 %v618_v38, 16  ;;  %v1444_v55 = vrot.slane %v1442_v45, 4  ;;  %v1077_v56 = vld [vmem:[#allocation2 + $0x34] sm:$0x1]  ;;  %v1447_v57 = vrot.slane %v1445_v50, 5  ;;  %v1451_v58 = vshll.u32 %v1414_v44, 16 }
 0x109   : > { %752 = vrot.lane.b32.xlu1 %v689_v41, %s2348_s29  ;;  %v923_v59 = vshrl.u32 %v906_v46, 16  ;;  %v926_v60 = vshll.u32 %v906_v46, 16  ;;  %v745_v61 = vsel %vm2424_vm7, %v740_v42, %v744_v29  ;;  %v1014_v62 = vrot.slane %v1013_v43, 4  ;;  %v914_v2 = vld [vmem:[#allocation2 + $0x28] sm:$0xf] }
 0x10a   : > { %v1018_v0 = vrot.slane %v1016_v31, 5  ;;  %v705_v1 = vshrl.u32 %v625_v51, 16  ;;  %v963_v4 = vsel %vm2424_vm7, %v958_v47, %v962_v63  ;;  %v655_v5 = vor.u32 %v654_v49, %v651_v48  ;;  %v907_v6 = vld [vmem:[#allocation2 + $0xc] sm:$0x1]  ;;  %v912_v13 = vld [vmem:[#allocation2 + $0x20] sm:$0xf] }
 0x10b   : > { %v925_v7 = vrot.slane %v923_v59, 4  ;;  %v928_v8 = vrot.slane %v926_v60, 5  ;;  %v1120_v9 = vrot.slane %v1077_v56, 5  ;;  %v660_v10 = vrot.slane %v658_v54, 5  ;;  %v626_v17 = vld [vmem:[#allocation2 + $0x2c] sm:$0x1] }
 0x10c   : > { %1038 = vrot.lane.b32.xlu0 %v963_v4, %s2348_s29  ;;  %v707_v11 = vrot.slane %v705_v1, 4  ;;  %v708_v12 = vshll.u32 %v625_v51, 16  ;;  %v1448_v14 = vor.u32 %v1447_v57, %v1444_v55  ;;  %v1453_v15 = vrot.slane %v1451_v58, 5  ;;  %v915_v23 = vld [vmem:[#allocation2 + $0x2c] sm:$0x1] }
 0x10d   : > { %760 = vrot.lane.b32.xlu1 %v745_v61, %s2348_s29  ;;  %v929_v16 = vor.u32 %v928_v8, %v925_v7  ;;  %v979_v18 = vshrl.u32 %v914_v2, 16  ;;  %v1105_v19 = vsel %vm2400_vm4, %v2104_v34, %v1104_v52  ;;  %v1019_v20 = vsel %vm2424_vm7, %v1014_v62, %v1018_v0  ;;  %v623_v27 = vld [vmem:[#allocation2 + $0x20] sm:$0xf]  ;;  %v913_v44 = vld [vmem:[#allocation2 + $0x24] sm:$0x1] }
 0x10e   : > { %v710_v21 = vrot.slane %v708_v12, 5  ;;  %v982_v25 = vshll.u32 %v914_v2, 16  ;;  %v656_v28 = vrot.slane %v655_v5, 4  ;;  %v932_v29 = vshll.u32 %v907_v6, 16  ;;  %v920_v34 = vld [vmem:[#allocation2 + $0x40] sm:$0xf] }
 0x10f   : > { %v981_v32 = vrot.slane %v979_v18, 4  ;;  %v965_v33 = vshrl.u32 %v912_v13, 16  ;;  %v714_v24 = vshll.u32 %v626_v17, 16  ;;  %v968_v26 = vshll.u32 %v912_v13, 16  ;;  %v1415_v47 = vld [vmem:[#allocation2 + $0x20] sm:$0xf] }
 0x110   : > { %1046 = vrot.lane.b32.xlu0 %v1019_v20, %s2348_s29  ;;  %v711_v35 = vor.u32 %v710_v21, %v707_v11  ;;  %v984_v30 = vrot.slane %v982_v25, 5  ;;  %v1449_v36 = vrot.slane %v1448_v14, 4  ;;  %v930_v37 = vrot.slane %v929_v16, 4  ;;  %v624_v51 = vld [vmem:[#allocation2 + $0x24] sm:$0x1] }
 0x111   : > { %1132 = vrot.lane.b32.xlu1 %v1105_v19, %s2347_s28  ;;  %v988_v63 = vshll.u32 %v915_v23, 16  ;;  %v691_v31 = vshrl.u32 %v623_v27, 16  ;;  %v967_v39 = vrot.slane %v965_v33, 4  ;;  %v970_v40 = vrot.slane %v968_v26, 5  ;;  %v627_v57 = vld [vmem:[#allocation2 + $0x30] sm:$0xf] }
 0x112   : > { %v985_v38 = vor.u32 %v984_v30, %v981_v32  ;;  %v694_v41 = vshll.u32 %v623_v27, 16  ;;  %v1121_v42 = vsel %vm2400_vm4, %v2108_v53, %v1120_v9  ;;  %v661_v43 = vsel %vm2424_vm7, %v656_v28, %v660_v10  ;;  %v921_v61 = vld [vmem:[#allocation2 + $0x44] sm:$0x1]  ;;  %v619_v5 = vld [vmem:[#allocation2 + $0x10] sm:$0xf] }
 0x113   : > { %v693_v45 = vrot.slane %v691_v31, 4  ;;  %v1021_v46 = vshrl.u32 %v920_v34, 16  ;;  %v934_v48 = vrot.slane %v932_v29, 5  ;;  %v712_v49 = vrot.slane %v711_v35, 4  ;;  %v1416_v12 = vld [vmem:[#allocation2 + $0x24] sm:$0x1] }
 0x114   : > { %748 = vrot.lane.b32.xlu0 %v661_v43, %s2348_s29  ;;  %v716_v50 = vrot.slane %v714_v24, 5  ;;  %v696_v52 = vrot.slane %v694_v41, 5  ;;  %v1454_v54 = vsel %vm2424_vm7, %v1449_v36, %v1453_v15  ;;  %v990_v53 = vrot.slane %v988_v63, 5  ;;  %v1417_v25 = vld [vmem:[#allocation2 + $0x28] sm:$0xf] }
 0x115   : > { %1140 = vrot.lane.b32.xlu1 %v1121_v42, %s2347_s28  ;;  %v1023_v55 = vrot.slane %v1021_v46, 4  ;;  %v1024_v56 = vshll.u32 %v920_v34, 16  ;;  %v935_v58 = vsel %vm2424_vm7, %v930_v37, %v934_v48  ;;  %v986_v59 = vrot.slane %v985_v38, 4  ;;  %v628_v35 = vld [vmem:[#allocation2 + $0x34] sm:$0x1] }
 0x116   : > { %v971_v60 = vor.u32 %v970_v40, %v967_v39  ;;  %v1456_v62 = vshrl.u32 %v1415_v47, 16  ;;  %v974_v0 = vshll.u32 %v913_v44, 16  ;;  %v697_v1 = vor.u32 %v696_v52, %v693_v45  ;;  %v620_v34 = vld [vmem:[#allocation2 + $0x14] sm:$0x1]  ;;  %v908_v40 = vld [vmem:[#allocation2 + $0x10] sm:$0xf] }
 0x117   : > { %v1026_v2 = vrot.slane %v1024_v56, 5  ;;  %v1459_v4 = vshll.u32 %v1415_v47, 16  ;;  %v717_v6 = vsel %vm2424_vm7, %v712_v49, %v716_v50  ;;  %v700_v7 = vshll.u32 %v624_v51, 16  ;;  %v1423_v45 = vld [vmem:[#allocation2 + $0x40] sm:$0xf] }
 0x118   : > { %1034 = vrot.lane.b32.xlu0 %v935_v58, %s2348_s29  ;;  %v1458_v8 = vrot.slane %v1456_v62, 4  ;;  %v719_v9 = vshrl.u32 %v627_v57, 16  ;;  %v1030_v11 = vshll.u32 %v921_v61, 16  ;;  %v722_v14 = vshll.u32 %v627_v57, 16  ;;  %v1571_v48 = vld [vmem:[#allocation2 + $0x10] sm:$0xe] }
 0x119   : > { %1541 = vrot.lane.b32.xlu1 %v1454_v54, %s2348_s29  ;;  %v1027_v10 = vor.u32 %v1026_v2, %v1023_v55  ;;  %v1461_v13 = vrot.slane %v1459_v4, 5  ;;  %v991_v15 = vsel %vm2424_vm7, %v986_v59, %v990_v53  ;;  %v972_v16 = vrot.slane %v971_v60, 4  ;;  %v1572_v49 = vld [vmem:[#allocation2 + $0x14] sm:$0x1]  ;;  %v1418_v52 = vld [vmem:[#allocation2 + $0x2c] sm:$0x1] }
 0x11a   : > { %v721_v17 = vrot.slane %v719_v9, 4  ;;  %v663_v18 = vshrl.u32 %v619_v5, 16  ;;  %v698_v19 = vrot.slane %v697_v1, 4  ;;  %v724_v21 = vrot.slane %v722_v14, 5  ;;  %v1575_v57 = vld [vmem:[#allocation2 + $0x20] sm:$0xe] }
 0x11b   : > { %v1462_v20 = vor.u32 %v1461_v13, %v1458_v8  ;;  %v666_v23 = vshll.u32 %v619_v5, 16  ;;  %v1465_v27 = vshll.u32 %v1416_v12, 16  ;;  %v976_v29 = vrot.slane %v974_v0, 5  ;;  %v1411_v60 = vld [vmem:[#allocation2 + $0x10] sm:$0xf] }
 0x11c   : > { %1042 = vrot.lane.b32.xlu0 %v991_v15, %s2348_s29  ;;  %v665_v28 = vrot.slane %v663_v18, 4  ;;  %v702_v32 = vrot.slane %v700_v7, 5  ;;  %v1028_v33 = vrot.slane %v1027_v10, 4  ;;  %v725_v26 = vor.u32 %v724_v21, %v721_v17  ;;  %v1576_v62 = vld [vmem:[#allocation2 + $0x24] sm:$0x1] }
 0x11d   : > { %756 = vrot.lane.b32.xlu1 %v717_v6, %s2348_s29  ;;  %v668_v24 = vrot.slane %v666_v23, 5  ;;  %v1463_v30 = vrot.slane %v1462_v20, 4  ;;  %v1470_v36 = vshrl.u32 %v1417_v25, 16  ;;  %v1473_v37 = vshll.u32 %v1417_v25, 16  ;;  %v916_v7 = vld [vmem:[#allocation2 + $0x30] sm:$0xf] }
 0x11e   : > { %v977_v63 = vsel %vm2424_vm7, %v972_v16, %v976_v29  ;;  %v703_v31 = vsel %vm2424_vm7, %v698_v19, %v702_v32  ;;  %v1032_v38 = vrot.slane %v1030_v11, 5  ;;  %v1467_v41 = vrot.slane %v1465_v27, 5  ;;  %v909_v9 = vld [vmem:[#allocation2 + $0x14] sm:$0x1]  ;;  %v1424_v18 = vld [vmem:[#allocation2 + $0x44] sm:$0x1] }
 0x11f   : > { %v669_v39 = vor.u32 %v668_v24, %v665_v28  ;;  %v728_v42 = vshll.u32 %v628_v35, 16  ;;  %v1472_v43 = vrot.slane %v1470_v36, 4  ;;  %v1475_v44 = vrot.slane %v1473_v37, 5  ;;  %v2619_v20 = vld [vmem:[#allocation2 + $0x48] sm:$0xf] }
 0x120   : > { %754 = vrot.lane.b32.xlu0 %v703_v31, %s2348_s29  ;;  %v1033_v46 = vsel %vm2424_vm7, %v1028_v33, %v1032_v38  ;;  %v672_v47 = vshll.u32 %v620_v34, 16  ;;  %v1468_v50 = vsel %vm2424_vm7, %v1463_v30, %v1467_v41  ;;  %v726_v51 = vrot.slane %v725_v26, 4  ;;  %v1573_v27 = vld [vmem:[#allocation2 + $0x18] sm:$0xe]  ;;  %v1574_v32 = vld [vmem:[#allocation2 + $0x1c] sm:$0x1] }
 0x121   : > { %1040 = vrot.lane.b32.xlu1 %v977_v63, %s2348_s29  ;;  %v937_v54 = vshrl.u32 %v908_v40, 16  ;;  %v940_v53 = vshll.u32 %v908_v40, 16  ;;  %v670_v55 = vrot.slane %v669_v39, 4  ;;  %v1476_v56 = vor.u32 %v1475_v44, %v1472_v43  ;;  %v1412_v36 = vld [vmem:[#allocation2 + $0x14] sm:$0x1] }
 0x122   : > { %v1512_v58 = vshrl.u32 %v1423_v45, 16  ;;  %v1515_v59 = vshll.u32 %v1423_v45, 16  ;;  %v730_v61 = vrot.slane %v728_v42, 5  ;;  %v674_v2 = vrot.slane %v672_v47, 5  ;;  %v1419_v63 = vld [vmem:[#allocation2 + $0x30] sm:$0xf] }
 0x123   : > { %v939_v0 = vrot.slane %v937_v54, 4  ;;  %v942_v1 = vrot.slane %v940_v53, 5  ;;  %v2134_v4 = vrot.slane %v1571_v48, 9  ;;  %v1605_v5 = vrot.slane %v1572_v49, 5  ;;  %v602_v31 = vld [vmem:[#allocation2 + $0x18] sm:$0xf] }
 0x124   : > { %1543 = vrot.lane.b32.xlu0 %v1468_v50, %s2348_s29  ;;  %v1479_v6 = vshll.u32 %v1418_v52, 16  ;;  %v731_v8 = vsel %vm2424_vm7, %v726_v51, %v730_v61  ;;  %v1514_v10 = vrot.slane %v1512_v58, 4  ;;  %v1517_v11 = vrot.slane %v1515_v59, 5  ;;  %v1421_v39 = vld [vmem:[#allocation2 + $0x38] sm:$0xf] }
 0x125   : > { %1048 = vrot.lane.b32.xlu1 %v1033_v46, %s2348_s29  ;;  %v1428_v12 = vshrl.u32 %v1411_v60, 16  ;;  %v675_v13 = vsel %vm2424_vm7, %v670_v55, %v674_v2  ;;  %v1477_v14 = vrot.slane %v1476_v56, 4  ;;  %v943_v15 = vor.u32 %v942_v1, %v939_v0  ;;  %610 = vst.msk [vmem:[#allocation3 + $0xc] sm:$0xf] %vm386_vm0, %v602_v31  ;;  %v606_v41 = vld [vmem:[#allocation2 + $0x38] sm:$0xf] }
 0x126   : > { %v1431_v16 = vshll.u32 %v1411_v60, 16  ;;  %v2136_v17 = vrot.slane %v1575_v57, 9  ;;  %v993_v19 = vshrl.u32 %v916_v7, 16  ;;  %v1481_v21 = vrot.slane %v1479_v6, 5  ;;  %614 = vst.msk [vmem:[#allocation3 + $0x1c] sm:$0xf] %vm386_vm0, %v606_v41 }
 0x127   : > { %v1613_v23 = vrot.slane %v1576_v62, 5  ;;  %v946_v25 = vshll.u32 %v909_v9, 16  ;;  %v996_v28 = vshll.u32 %v916_v7, 16  ;;  %v1518_v29 = vor.u32 %v1517_v11, %v1514_v10  ;;  %v600_v46 = vld [vmem:[#allocation2 + $0x8] sm:$0xf] }
 0x128   : > { %758 = vrot.lane.b32.xlu0 %v731_v8, %s2348_s29  ;;  %v1430_v33 = vrot.slane %v1428_v12, 4  ;;  %v1433_v35 = vrot.slane %v1431_v16, 5  ;;  %v995_v24 = vrot.slane %v993_v19, 4  ;;  %v1606_v30 = vsel %vm2400_vm4, %v2134_v4, %v1605_v5  ;;  %v917_v49 = vld [vmem:[#allocation2 + $0x34] sm:$0x1] }
 0x129   : > { %750 = vrot.lane.b32.xlu1 %v675_v13, %s2348_s29  ;;  %v1482_v26 = vsel %vm2424_vm7, %v1477_v14, %v1481_v21  ;;  %v944_v34 = vrot.slane %v943_v15, 4  ;;  %v998_v37 = vrot.slane %v996_v28, 5  ;;  %v1521_v38 = vshll.u32 %v1424_v18, 16  ;;  %608 = vst.msk [vmem:[#allocation3 + $0x4] sm:$0xf] %vm386_vm0, %v600_v46 }
 0x12a   : > { %v1526_v40 = vshrl.u32 %v2619_v20, 16  ;;  %v1614_v42 = vsel %vm2400_vm4, %v2136_v17, %v1613_v23  ;;  %v948_v43 = vrot.slane %v946_v25, 5  ;;  %v2135_v44 = vrot.slane %v1573_v27, 9  ;;  %v604_v52 = vld [vmem:[#allocation2 + $0x28] sm:$0xf]  ;;  %v2323_v25 = vld [vmem:[%s2860_s2] sm:$0xff]  }
 0x12b   : > { %v1609_v45 = vrot.slane %v1574_v32, 5  ;;  %v1519_v47 = vrot.slane %v1518_v29, 4  ;;  %v1434_v48 = vor.u32 %v1433_v35, %v1430_v33  ;;  %v999_v50 = vor.u32 %v998_v37, %v995_v24  ;;  %612 = vst.msk [vmem:[#allocation3 + $0x14] sm:$0xf] %vm386_vm0, %v604_v52  ;;  %v1579_v59 = vld [vmem:[#allocation2 + $0x30] sm:$0xe] }
 0x12c   : > { %1635 = vrot.lane.b32.xlu0 %v1606_v30, %s2347_s28  ;;  %v1484_v51 = vshrl.u32 %v1419_v63, 16  ;;  %v949_v54 = vsel %vm2424_vm7, %v944_v34, %v948_v43  ;;  %v1487_v53 = vshll.u32 %v1419_v63, 16  ;;  %v1498_v55 = vshrl.u32 %v1421_v39, 16  ;;  %v1580_v60 = vld [vmem:[#allocation2 + $0x34] sm:$0x1] }
 0x12d   : > { %1545 = vrot.lane.b32.xlu1 %v1482_v26, %s2348_s29  ;;  %v1501_v56 = vshll.u32 %v1421_v39, 16  ;;  %v1523_v57 = vrot.slane %v1521_v38, 5  ;;  %v1437_v58 = vshll.u32 %v1412_v36, 16  ;;  %v603_v61 = vld [vmem:[#allocation2 + $0x20] sm:$0xf]  ;;  %v1610_v62 = vsel %vm2400_vm4, %v2135_v44, %v1609_v45  ;;  %v2325_v36 = vld [vmem:[%s2860_s2 + $0xc] sm:$0xff]  }
 0x12e   : > { %v1002_v0 = vshll.u32 %v917_v49, 16  ;;  %v1577_v1 = vld [vmem:[#allocation2 + $0x28] sm:$0xe]  ;;  %v1578_v2 = vld [vmem:[#allocation2 + $0x2c] sm:$0x1]  ;;  %v1529_v4 = vshll.u32 %v2619_v20, 16 }
 0x12f   : > { %611 = vst.msk [vmem:[#allocation3 + $0x10] sm:$0xf] %vm386_vm0, %v603_v61  ;;  %v1524_v5 = vsel %vm2424_vm7, %v1519_v47, %v1523_v57  ;;  %v1435_v6 = vrot.slane %v1434_v48, 4  ;;  %v1000_v7 = vrot.slane %v999_v50, 4  ;;  %v1486_v8 = vrot.slane %v1484_v51, 4 }
 0x130   : > { %1639 = vrot.lane.b32.xlu0 %v1614_v42, %s2347_s28  ;;  %v605_v9 = vld [vmem:[#allocation2 + $0x30] sm:$0xf]  ;;  %v1489_v10 = vrot.slane %v1487_v53, 5  ;;  %v1422_v11 = vld [vmem:[#allocation2 + $0x3c] sm:$0x1]  ;;  %v1500_v12 = vrot.slane %v1498_v55, 4 }
 0x131   : > { %1036 = vrot.lane.b32.xlu1 %v949_v54, %s2348_s29  ;;  %v1503_v13 = vrot.slane %v1501_v56, 5  ;;  %613 = vst.msk [vmem:[#allocation3 + $0x18] sm:$0xf] %vm386_vm0, %v605_v9  ;;  %v1439_v14 = vrot.slane %v1437_v58, 5  ;;  %v1426_v15 = vld [vmem:[#allocation2 + $0x4c] sm:$0x1] }
 0x132   : > { %v1528_v16 = vrot.slane %v1526_v40, 4  ;;  %v601_v17 = vld [vmem:[#allocation2 + $0x10] sm:$0xf]  ;;  %v2322_v18 = vld [vmem:[%s2860_s2 + $0x8] ss:$0 sps:$4 sm:$0xff]   ;;  %v1004_v19 = vrot.slane %v1002_v0, 5  ;;  %v1490_v24 = vor.u32 %v1489_v10, %v1486_v8 }
 0x133   : > { %v2138_v20 = vrot.slane %v1579_v59, 9  ;;  %v1621_v21 = vrot.slane %v1580_v60, 5  ;;  %v1531_v23 = vrot.slane %v1529_v4, 5  ;;  %609 = vst.msk [vmem:[#allocation3 + $0x8] sm:$0xf] %vm386_vm0, %v601_v17  ;;  %v1440_v27 = vsel %vm2424_vm7, %v1435_v6, %v1439_v14  ;;  %2302 = vmatprep.subr.msk.bf16.mxu0 %vm1216_vm15, %v2322_v18 }
 0x134   : > { %1551 = vrot.lane.b32.xlu0 %v1524_v5, %s2348_s29  ;;  %v2137_v28 = vrot.slane %v1577_v1, 9  ;;  %v1617_v29 = vrot.slane %v1578_v2, 5  ;;  %v1420_v32 = vld [vmem:[#allocation2 + $0x34] sm:$0x1]  ;;  %v1327_v33 = vsel %vm1216_vm15, %v2322_v18, 0  ;;  %v1005_v35 = vsel %vm2424_vm7, %v1000_v7, %v1004_v19 }
 0x135   : > { %1637 = vrot.lane.b32.xlu1 %v1610_v62, %s2347_s28  ;;  %v1504_v30 = vor.u32 %v1503_v13, %v1500_v12  ;;  %v1507_v26 = vshll.u32 %v1422_v11, 16  ;;  %2264 = vmatpush3.bf16.msra.mxu0 %v1327_v33  ;;  %v2324_v34 = vld [vmem:[%s2860_s2 + $0x14] ss:$0 sps:$4 sm:$0xff]   ;;  %v1493_v37 = vshll.u32 %v1420_v32, 16  ;;  %v1532_v63 = vor.u32 %v1531_v23, %v1528_v16  ;;  %v2677_v44 = vld [vmem:[%s2860_s2 + $0x20] ss:$0 sps:$4 sm:$0xff]  }
 0x136   : > { %v1535_v31 = vshll.u32 %v1426_v15, 16  ;;  %2265 = vmatprep.subr.bf16.mxu0 %v2323_v25  ;;  %2301 = vmatprep.subr.msk.bf16.mxu1 %vm1216_vm15, %v2324_v34  ;;  %v1218_v38 = vsel %vm1216_vm15, %v2324_v34, 0  ;;  %v1622_v39 = vsel %vm2400_vm4, %v2138_v20, %v1621_v21  ;;  %v1618_v40 = vsel %vm2400_vm4, %v2137_v28, %v1617_v29  ;;  %v1583_v45 = vld [vmem:[#allocation2 + $0x40] sm:$0xe]  ;;  %v1584_v46 = vld [vmem:[#allocation2 + $0x44] sm:$0x1] }
 0x137   : > { %2252 = vmatpush3.bf16.msra.mxu1 %v1218_v38  ;;  %v1491_v41 = vrot.slane %v1490_v24, 4  ;;  %v1505_v42 = vrot.slane %v1504_v30, 4  ;;  %v1509_v43 = vrot.slane %v1507_v26, 5  ;;  %v1495_v47 = vrot.slane %v1493_v37, 5  ;;  %v1581_v53 = vld [vmem:[#allocation2 + $0x38] sm:$0xe] }
 0x138   : > { %1539 = vrot.lane.b32.xlu0 %v1440_v27, %s2348_s29  ;;  %2253 = vmatprep.subr.bf16.mxu1 %v2325_v36  ;;  %v1533_v48 = vrot.slane %v1532_v63, 4  ;;  %v1537_v49 = vrot.slane %v1535_v31, 5  ;;  %v2140_v52 = vrot.slane %v1583_v45, 9  ;;  %v1629_v54 = vrot.slane %v1584_v46, 5  ;;  %v1582_v55 = vld [vmem:[#allocation2 + $0x3c] sm:$0x1] }
 0x139   : > { %1044 = vrot.lane.b32.xlu1 %v1005_v35, %s2348_s29  ;;  %2266 = vmatpush3.bf16.msra.mxu0 %v2323_v25  ;;  %v1496_v50 = vsel %vm2424_vm7, %v1491_v41, %v1495_v47  ;;  %v1510_v51 = vsel %vm2424_vm7, %v1505_v42, %v1509_v43  ;;  %v1585_v57 = vld [vmem:[#allocation2 + $0x48] sm:$0xe]  ;;  %v1586_v58 = vld [vmem:[#allocation2 + $0x4c] sm:$0x1]  ;;  %v2139_v60 = vrot.slane %v1581_v53, 9  ;;  %v1625_v61 = vrot.slane %v1582_v55, 5 }
 0x13a   : > { %v1538_v56 = vsel %vm2424_vm7, %v1533_v48, %v1537_v49  ;;  %v1630_v59 = vsel %vm2400_vm4, %v2140_v52, %v1629_v54  ;;  %v2141_v62 = vrot.slane %v1585_v57, 9  ;;  %v1633_v0 = vrot.slane %v1586_v58, 5  ;;  %v893_v21 = vld [vmem:[#allocation2 + $0x20] sm:$0xf]  ;;  %v890_v30 = vld [vmem:[#allocation2 + $0x8] sm:$0xf] }
 0x13b   : > { %2254 = vmatpush3.bf16.msra.mxu1 %v2325_v36  ;;  %v1626_v1 = vsel %vm2400_vm4, %v2139_v60, %v1625_v61  ;;  %v897_v28 = vld [vmem:[#allocation2 + $0x40] sm:$0xf]  ;;  %v891_v26 = vld [vmem:[#allocation2 + $0x10] sm:$0xf]  ;;  %v896_v45 = vld [vmem:[#allocation2 + $0x38] sm:$0xf] }
 0x13c   : > { %1643 = vrot.lane.b32.xlu0 %v1622_v39, %s2347_s28  ;;  %2303 = vmatprep.subr.msk.bf16.mxu1 %vm1216_vm15, %v2677_v44  ;;  %v1634_v22 = vsel %vm2400_vm4, %v2141_v62, %v1633_v0  ;;  %v894_v39 = vld [vmem:[#allocation2 + $0x28] sm:$0xf]  ;;  %v895_v41 = vld [vmem:[#allocation2 + $0x30] sm:$0xf]  ;;  %v892_v49 = vld [vmem:[#allocation2 + $0x18] sm:$0xf] }
 0x13d   : > { %1641 = vrot.lane.b32.xlu1 %v1618_v40, %s2347_s28  ;;  %v1396_v53 = vld [vmem:[#allocation2 + $0x18] sm:$0xf]  ;;  %v1395_v58 = vld [vmem:[#allocation2 + $0x10] sm:$0xf]  ;;  %v1398_v60 = vld [vmem:[#allocation2 + $0x28] sm:$0xf] }
 0x13e   : > { %v1397_v61 = vld [vmem:[#allocation2 + $0x20] sm:$0xf] }
 0x140   : > { %1547 = vrot.lane.b32.xlu0 %v1496_v50, %s2348_s29 }
 0x141   : > { %1549 = vrot.lane.b32.xlu1 %v1510_v51, %s2348_s29 }
 0x144   : > { %1647 = vrot.lane.b32.xlu0 %v1630_v59, %s2347_s28  ;;  %v1402_v59 = vld [vmem:[#allocation2 + $0x48] sm:$0xf] }
 0x145   : > { %1553 = vrot.lane.b32.xlu1 %v1538_v56, %s2348_s29 }
 0x149   : > { %1645 = vrot.lane.b32.xlu1 %v1626_v1, %s2347_s28 }
 0x14d   : > { %1649 = vrot.lane.b32.xlu1 %v1634_v22, %s2347_s28  ;;  %v1401_v22 = vld [vmem:[#allocation2 + $0x40] sm:$0xf] }
 0x162   : > { %v2701_v2 = vpop.permute.xlu0 %1134 }
 0x163   : > { %v853_v4 = vpop.permute.xlu1 %852 }
 0x166   : > { %v2703_v5 = vpop.permute.xlu0 %1142 }
 0x167   : > { %v861_v6 = vpop.permute.xlu1 %860 }
 0x16a   : > { %v1131_v7 = vpop.permute.xlu0 %1130 }
 0x16b   : > { %v849_v8 = vpop.permute.xlu1 %848 }
 0x16e   : > { %v2705_v9 = vpop.permute.xlu0 %1138 }
 0x16f   : > { %v857_v10 = vpop.permute.xlu1 %856 }
 0x172   : > { %v855_v12 = vpop.permute.xlu0 %854 }
 0x173   : > { %v1137_v11 = vpop.permute.xlu1 %1136 }
 0x176   : > { %v851_v14 = vpop.permute.xlu0 %850 }
 0x177   : > { %v1145_v13 = vpop.permute.xlu1 %1144 }
 0x17a   : > { %v859_v3 = vpop.permute.xlu0 %858 }
 0x17b   : > { %v753_v15 = vpop.permute.xlu1 %752 }
 0x17c   : > { %774 = vst.msk [vmem:[#allocation3 + $0xc] sm:$0xf] %vm770_vm13, %v753_v15 }
 0x17d   : > { %874 = vst.msk [vmem:[#allocation3 + $0xc] sm:$0xf] %vm870_vm14, %v853_v4 }
 0x17e   : > { %v2709_v17 = vpop.permute.xlu0 %1038 }
 0x17f   : > { %v761_v16 = vpop.permute.xlu1 %760 }
 0x180   : > { %778 = vst.msk [vmem:[#allocation3 + $0x1c] sm:$0xf] %vm770_vm13, %v761_v16 }
 0x181   : > { %878 = vst.msk [vmem:[#allocation3 + $0x1c] sm:$0xf] %vm870_vm14, %v861_v6  ;;  %v2327_v6 = vld [vmem:[%s2860_s2 + $0x18] sm:$0xff]  }
 0x182   : > { %v1047_v19 = vpop.permute.xlu0 %1046 }
 0x183   : > { %v1133_v18 = vpop.permute.xlu1 %1132 }
 0x184   : > { %v2713_v20 = vld [vmem:[#allocation3 + $0xc] sm:$0xf] }
 0x185   : > { %901 = vst.msk [vmem:[#allocation3 + $0xc] sm:$0xf] %vm386_vm0, %v893_v21 }
 0x186   : > { %v749_v25 = vpop.permute.xlu0 %748 }
 0x187   : > { %v2716_v23 = vpop.permute.xlu1 %1140  ;;  %772 = vst.msk [vmem:[#allocation3 + $0x4] sm:$0xf] %vm770_vm13, %v749_v25 }
 0x188   : > { %v2719_v27 = vld [vmem:[#allocation3 + $0x1c] sm:$0xf]  ;;  %872 = vst.msk [vmem:[#allocation3 + $0x4] sm:$0xf] %vm870_vm14, %v849_v8 }
 0x189   : > { %905 = vst.msk [vmem:[#allocation3 + $0x1c] sm:$0xf] %vm386_vm0, %v897_v28 }
 0x18a   : > { %v1035_v32 = vpop.permute.xlu0 %1034 }
 0x18b   : > { %v2723_v29 = vpop.permute.xlu1 %1541 }
 0x18e   : > { %v1043_v35 = vpop.permute.xlu0 %1042 }
 0x18f   : > { %v757_v33 = vpop.permute.xlu1 %756  ;;  %v879_v24 = vld [vmem:[#allocation3] sm:$0xff]  }
 0x190   : > { %776 = vst.msk [vmem:[#allocation3 + $0x14] sm:$0xf] %vm770_vm13, %v757_v33  ;;  %2267 = vmatprep.mubr.msk.bf16.mxu0 %vm1203_vm1, %v879_v24 }
 0x191   : > { %898 = vst.msk [vmem:[#allocation3] sm:$0xf] %vm386_vm0, %v890_v30  ;;  %899 = vst.msk [vmem:[#allocation3 + $0x4] sm:$0xf] %vm386_vm0, %v891_v26 }
 0x192   : > { %876 = vst.msk [vmem:[#allocation3 + $0x14] sm:$0xf] %vm870_vm14, %v857_v10  ;;  %v755_v36 = vpop.permute.xlu0 %754  ;;  %v1400_v10 = vld [vmem:[#allocation2 + $0x38] sm:$0xf] }
 0x193   : > { %1058 = vst.msk [vmem:[#allocation3] sm:$0xf] %vm770_vm13, %v1035_v32  ;;  %v1041_v34 = vpop.permute.xlu1 %1040  ;;  %775 = vst.msk [vmem:[#allocation3 + $0x10] sm:$0xf] %vm770_vm13, %v755_v36 }
 0x194   : > { %1154 = vst.msk [vmem:[#allocation3] sm:$0xf] %vm870_vm14, %v1131_v7  ;;  %875 = vst.msk [vmem:[#allocation3 + $0x10] sm:$0xf] %vm870_vm14, %v855_v12 }
 0x195   : > { %1061 = vst.msk [vmem:[#allocation3 + $0xc] sm:$0xf] %vm770_vm13, %v1041_v34 }
 0x196   : > { %1157 = vst.msk [vmem:[#allocation3 + $0xc] sm:$0xf] %vm870_vm14, %v1137_v11  ;;  %v2736_v63 = vpop.permute.xlu0 %1543 }
 0x197   : > { %v1049_v37 = vpop.permute.xlu1 %1048 }
 0x198   : > { %1065 = vst.msk [vmem:[#allocation3 + $0x1c] sm:$0xf] %vm770_vm13, %v1049_v37 }
 0x199   : > { %1161 = vst.msk [vmem:[#allocation3 + $0x1c] sm:$0xf] %vm870_vm14, %v1145_v13 }
 0x19a   : > { %v759_v31 = vpop.permute.xlu0 %758 }
 0x19b   : > { %v751_v38 = vpop.permute.xlu1 %750  ;;  %v883_v40 = vld [vmem:[#allocation3 + $0x10] sm:$0xff]   ;;  %777 = vst.msk [vmem:[#allocation3 + $0x18] sm:$0xf] %vm770_vm13, %v759_v31 }
 0x19c   : > { %773 = vst.msk [vmem:[#allocation3 + $0x8] sm:$0xf] %vm770_vm13, %v751_v38 }
 0x19d   : > { %902 = vst.msk [vmem:[#allocation3 + $0x10] sm:$0xf] %vm386_vm0, %v894_v39  ;;  %903 = vst.msk [vmem:[#allocation3 + $0x14] sm:$0xf] %vm386_vm0, %v895_v41  ;;  %v2155_v39 = vld [vmem:[%s2862_s4 + $0x2] ss:$0 sm:$0xff] }
 0x19e   : > { %877 = vst.msk [vmem:[#allocation3 + $0x18] sm:$0xf] %vm870_vm14, %v859_v3  ;;  %873 = vst.msk [vmem:[#allocation3 + $0x8] sm:$0xf] %vm870_vm14, %v851_v14  ;;  %v1636_v42 = vpop.permute.xlu0 %1635 }
 0x19f   : > { %1062 = vst.msk [vmem:[#allocation3 + $0x10] sm:$0xf] %vm770_vm13, %v1043_v35  ;;  %v1546_v43 = vpop.permute.xlu1 %1545 }
 0x1a0   : > { %1158 = vst.msk [vmem:[#allocation3 + $0x10] sm:$0xf] %vm870_vm14, %v2705_v9  ;;  %v1399_v9 = vld [vmem:[#allocation2 + $0x30] sm:$0xf] }
 0x1a2   : > { %v1640_v46 = vpop.permute.xlu0 %1639 }
 0x1a3   : > { %v1037_v47 = vpop.permute.xlu1 %1036 }
 0x1a4   : > { %1059 = vst.msk [vmem:[#allocation3 + $0x4] sm:$0xf] %vm770_vm13, %v1037_v47 }
 0x1a5   : > { %v885_v48 = vld [vmem:[#allocation3 + $0x18] sm:$0xf]  ;;  %v881_v50 = vld [vmem:[#allocation3 + $0x8] sm:$0xf]  ;;  %1155 = vst.msk [vmem:[#allocation3 + $0x4] sm:$0xf] %vm870_vm14, %v1133_v18 }
 0x1a6   : > { %904 = vst.msk [vmem:[#allocation3 + $0x18] sm:$0xf] %vm386_vm0, %v896_v45  ;;  %900 = vst.msk [vmem:[#allocation3 + $0x8] sm:$0xf] %vm386_vm0, %v892_v49  ;;  %v2125_v51 = vcombine.low %v881_v50, %v2713_v20  ;;  %v1552_v52 = vpop.permute.xlu0 %1551  ;;  %v2127_v62 = vcombine.low %v885_v48, %v2719_v27  ;;  %v1832_v18 = vld [vmem:[%s2861_s3] sm:$0xf] }
 0x1a7   : > { %1064 = vst.msk [vmem:[#allocation3 + $0x18] sm:$0xf] %vm770_vm13, %v1047_v19  ;;  %1060 = vst.msk [vmem:[#allocation3 + $0x8] sm:$0xf] %vm770_vm13, %v2709_v17  ;;  %v1638_v54 = vpop.permute.xlu1 %1637  ;;  %2304 = vmatprep.subr.msk.bf16.mxu0 %vm1216_vm15, %v1832_v18  ;;  %v1847_v19 = vsel %vm1216_vm15, %v1832_v18, 0 }
 0x1a8   : > { %1160 = vst.msk [vmem:[#allocation3 + $0x18] sm:$0xf] %vm870_vm14, %v2703_v5  ;;  %1156 = vst.msk [vmem:[#allocation3 + $0x8] sm:$0xf] %vm870_vm14, %v2701_v2  ;;  %2268 = vmatmul.mubr.msk.bf16.vlgmr.msra.gmra.mxu0 %vm1203_vm1, %v2125_v51  ;;  %v1721_v5 = vsel %vm1216_vm15, %v2677_v44, 0 }
 0x1a9   : > { %2271 = vmatprep.mubr.msk.bf16.mxu0 %vm1203_vm1, %v883_v40  ;;  %2288 = vmatpush3.bf16.msra.mxu0 %v1847_v19  ;;  %v2156_v49 = vld [vmem:[%s2862_s4 + $0x3] ss:$0 sm:$0xff] }
 0x1aa   : > { %v1540_v55 = vpop.permute.xlu0 %1539 }
 0x1ab   : > { %v1045_v56 = vpop.permute.xlu1 %1044 }
 0x1ac   : > { %v1163_v57 = vld [vmem:[#allocation3] sm:$0xff]   ;;  %1063 = vst.msk [vmem:[#allocation3 + $0x14] sm:$0xf] %vm770_vm13, %v1045_v56 }
 0x1ad   : > { %1404 = vst.msk [vmem:[#allocation3 + $0x4] sm:$0xf] %vm386_vm0, %v1396_v53  ;;  %1403 = vst.msk [vmem:[#allocation3] sm:$0xf] %vm386_vm0, %v1395_v58  ;;  %2255 = vmatprep.mubr.msk.bf16.mxu1 %vm1203_vm1, %v1163_v57 }
 0x1ae   : > { %1159 = vst.msk [vmem:[#allocation3 + $0x14] sm:$0xf] %vm870_vm14, %v2716_v23  ;;  %v1644_v2 = vpop.permute.xlu0 %1643 }
 0x1af   : > { %v1165_v0 = vld [vmem:[#allocation3 + $0x8] sm:$0xff]   ;;  %v1168_v1 = vld [vmem:[#allocation3 + $0x18] sm:$0xff]   ;;  %1564 = vst.msk [vmem:[#allocation3 + $0x4] sm:$0xf] %vm770_vm13, %v2723_v29  ;;  %1563 = vst.msk [vmem:[#allocation3] sm:$0xf] %vm770_vm13, %v1540_v55  ;;  %v1642_v4 = vpop.permute.xlu1 %1641 }
 0x1b0   : > { %1406 = vst.msk [vmem:[#allocation3 + $0xc] sm:$0xf] %vm386_vm0, %v1398_v60  ;;  %1405 = vst.msk [vmem:[#allocation3 + $0x8] sm:$0xf] %vm386_vm0, %v1397_v61  ;;  %2272 = vmatmul.mubr.msk.bf16.gmra.mxu0 %vm1203_vm1, %v2127_v62  ;;  %2256 = vmatmul.mubr.msk.bf16.vlgmr.msra.gmra.mxu1 %vm1203_vm1, %v1165_v0 }
 0x1b1   : > { %1409 = vst.msk [vmem:[#allocation3 + $0x18] sm:$0xf] %vm386_vm0, %v1401_v22  ;;  %1410 = vst.msk [vmem:[#allocation3 + $0x1c] sm:$0xf] %vm386_vm0, %v1402_v59  ;;  %2276 = vmatpush3.bf16.msra.mxu1 %v1721_v5 }
 0x1b2   : > { %1660 = vst.msk [vmem:[#allocation3 + $0x4] sm:$0xf] %vm870_vm14, %v1638_v54  ;;  %1659 = vst.msk [vmem:[#allocation3] sm:$0xf] %vm870_vm14, %v1636_v42  ;;  %v1548_v44 = vpop.permute.xlu0 %1547  ;;  %2277 = vmatprep.subr.bf16.mxu1 %v2327_v6 }
 0x1b3   : > { %1566 = vst.msk [vmem:[#allocation3 + $0xc] sm:$0xf] %vm770_vm13, %v1546_v43  ;;  %1565 = vst.msk [vmem:[#allocation3 + $0x8] sm:$0xf] %vm770_vm13, %v2736_v63  ;;  %v1550_v7 = vpop.permute.xlu1 %1549 }
 0x1b4   : > { %1569 = vst.msk [vmem:[#allocation3 + $0x18] sm:$0xf] %vm770_vm13, %v1552_v52 }
 0x1b5   : > { %1661 = vst.msk [vmem:[#allocation3 + $0x8] sm:$0xf] %vm870_vm14, %v1640_v46  ;;  %1662 = vst.msk [vmem:[#allocation3 + $0xc] sm:$0xf] %vm870_vm14, %v1642_v4  ;;  %v1166_v8 = vld [vmem:[#allocation3 + $0x10] sm:$0xff]   ;;  %2278 = vmatpush3.bf16.msra.mxu1 %v2327_v6 }
 0x1b6   : > { %1407 = vst.msk [vmem:[#allocation3 + $0x10] sm:$0xf] %vm386_vm0, %v1399_v9  ;;  %1408 = vst.msk [vmem:[#allocation3 + $0x14] sm:$0xf] %vm386_vm0, %v1400_v10  ;;  %v1648_v11 = vpop.permute.xlu0 %1647  ;;  %2259 = vmatprep.mubr.msk.bf16.mxu1 %vm1203_vm1, %v1166_v8  ;;  %vm1833_vm0 = vcmask 64512  }
 0x1b7   : > { %1567 = vst.msk [vmem:[#allocation3 + $0x10] sm:$0xf] %vm770_vm13, %v1548_v44  ;;  %1568 = vst.msk [vmem:[#allocation3 + $0x14] sm:$0xf] %vm770_vm13, %v1550_v7  ;;  %v1554_v12 = vpop.permute.xlu1 %1553 }
 0x1b8   : > { %1663 = vst.msk [vmem:[#allocation3 + $0x10] sm:$0xf] %vm870_vm14, %v1644_v2  ;;  %1665 = vst.msk [vmem:[#allocation3 + $0x18] sm:$0xf] %vm870_vm14, %v1648_v11  ;;  %2260 = vmatmul.mubr.msk.bf16.gmra.mxu1 %vm1203_vm1, %v1168_v1 }
 0x1b9   : > { %1570 = vst.msk [vmem:[#allocation3 + $0x1c] sm:$0xf] %vm770_vm13, %v1554_v12  ;;  %v2328_v13 = vld [vmem:[#allocation3] sm:$0xff]  }
 0x1ba   : > { %2279 = vmatprep.mubr.msk.bf16.mxu1 %vm1203_vm1, %v2328_v13 }
 0x1bb   : > { %v1646_v14 = vpop.permute.xlu1 %1645 }
 0x1bc   : > { %1664 = vst.msk [vmem:[#allocation3 + $0x14] sm:$0xf] %vm870_vm14, %v1646_v14  ;;  %v2329_v3 = vld [vmem:[#allocation3 + $0x8] sm:$0xff]  }
 0x1bf   : > { %v1650_v15 = vpop.permute.xlu1 %1649 }
 0x1c0   : > { %1666 = vst.msk [vmem:[#allocation3 + $0x1c] sm:$0xf] %vm870_vm14, %v1650_v15  ;;  %2280 = vmatmul.mubr.msk.bf16.vlgmr.msra.gmra.mxu1 %vm1203_vm1, %v2329_v3 }
 0x1c3   : > { %v2330_v16 = vld [vmem:[#allocation3 + $0x10] sm:$0xff]  }
 0x1c4   : > { %2283 = vmatprep.mubr.msk.bf16.mxu1 %vm1203_vm1, %v2330_v16 }
 0x1c7   : > { %v2331_v17 = vld [vmem:[#allocation3 + $0x18] sm:$0xff]  }
 0x1c8   : > { %2284 = vmatmul.mubr.msk.bf16.gmra.mxu1 %vm1203_vm1, %v2331_v17 }
 0x268   : > { %v2269_v20 = vpop.f32.mrf.mxu0 }
 0x26a   : > { %v1363_v25 = vpop.f32.mrf.mxu0 }
 0x26c   : > { %v2270_v29 = vpop.f32.mrf.mxu0 }
 0x26e   : > { %v1366_v35 = vpop.f32.mrf.mxu0 }
 0x270   : > { %v2257_v21 = vpop.f32.mrf.mxu1  ;;  %v2273_v26 = vpop.f32.mrf.mxu0 }
 0x271   : > { %v1372_v34 = vadd.f32 %v2269_v20, %v2257_v21 }
 0x272   : > { %v1254_v23 = vpop.f32.mrf.mxu1  ;;  %v1379_v41 = vpop.f32.mrf.mxu0 }
 0x273   : > { %v1364_v37 = vadd.f32 %v1363_v25, %v1254_v23 }
 0x274   : > { %v2258_v27 = vpop.f32.mrf.mxu1  ;;  %v2274_v52 = vpop.f32.mrf.mxu0 }
 0x275   : > { %v1375_v38 = vadd.f32 %v2270_v29, %v2258_v27  ;;  %v2161_v29 = vld [vmem:[%s2862_s4 + $0x4] ss:$0 sm:$0xff] }
 0x276   : > { %v1257_v28 = vpop.f32.mrf.mxu1  ;;  %v1382_v1 = vpop.f32.mrf.mxu0 }
 0x277   : > { %v1367_v43 = vadd.f32 %v1366_v35, %v1257_v28 }
 0x278   : > { %v2261_v32 = vpop.f32.mrf.mxu1 }
 0x279   : > { %v1388_v54 = vadd.f32 %v2273_v26, %v2261_v32  ;;  %v2207_v32 = vld [vmem:[%s2409_s27 + $0x8] sm:$0xff]  }
 0x27a   : > { %v1270_v33 = vpop.f32.mrf.mxu1  ;;  %v2197_v26 = vunpack.c.l.bf16 %v2207_v32 }
 0x27b   : > { %v1380_v55 = vadd.f32 %v1379_v41, %v1270_v33  ;;  %v2162_v33 = vld [vmem:[%s2862_s4 + $0x5] ss:$0 sm:$0xff]  ;;  %v2198_v41 = vunpack.c.h.bf16 %v2207_v32 }
 0x27c   : > { %v2262_v24 = vpop.f32.mrf.mxu1 }
 0x27d   : > { %v1391_v22 = vadd.f32 %v2274_v52, %v2262_v24  ;;  %v2192_v24 = vld [vmem:[%s2409_s27] sm:$0xff]  }
 0x27e   : > { %v1273_v30 = vpop.f32.mrf.mxu1 }
 0x27f   : > { %v1383_v5 = vadd.f32 %v1382_v1, %v1273_v30 }
 0x280   : > { %v2281_v36 = vpop.f32.mrf.mxu1 }
 0x281   : > { %v1790_v63 = vadd.f32 %v2281_v36, %v1372_v34 }
 0x282   : > { %v1757_v31 = vpop.f32.mrf.mxu1 }
 0x283   : > { %v1788_v40 = vadd.f32 %v1757_v31, %v1364_v37  ;;  %v1802_v47 = vmul.f32 %v2155_v39, %v1790_v63  ;;  %v2193_v63 = vunpack.c.l.bf16 %v2192_v24 }
 0x284   : > { %v2282_v42 = vpop.f32.mrf.mxu1 }
 0x285   : > { %v1800_v45 = vmul.f32 %v2155_v39, %v1788_v40  ;;  %v1791_v46 = vadd.f32 %v2282_v42, %v1375_v38  ;;  %v1814_v59 = vadd.f32 %v2156_v49, %v1802_v47 }
 0x286   : > { %v1760_v48 = vpop.f32.mrf.mxu1 }
 0x287   : > { %v1803_v50 = vmul.f32 %v2155_v39, %v1791_v46  ;;  %v1789_v51 = vadd.f32 %v1760_v48, %v1367_v43  ;;  %v1812_v56 = vadd.f32 %v2156_v49, %v1800_v45  ;;  %v1822_v8 = vmax.f32 %v1814_v59, 0.0 }
 0x288   : > { %v2285_v53 = vpop.f32.mrf.mxu1  ;;  %v2194_v43 = vunpack.c.h.bf16 %v2192_v24 }
 0x289   : > { %v1815_v57 = vadd.f32 %v2156_v49, %v1803_v50  ;;  %v1801_v58 = vmul.f32 %v2155_v39, %v1789_v51  ;;  %v1794_v60 = vadd.f32 %v2285_v53, %v1388_v54  ;;  %v1820_v6 = vmax.f32 %v1812_v56, 0.0  ;;  %v2208_v50 = vld [vmem:[%s2409_s27 + $0x10] sm:$0xff]  }
 0x28a   : > { %v1773_v61 = vpop.f32.mrf.mxu1  ;;  %v2201_v59 = vunpack.c.l.bf16 %v2208_v50 }
 0x28b   : > { %v1813_v62 = vadd.f32 %v2156_v49, %v1801_v58  ;;  %v1792_v0 = vadd.f32 %v1773_v61, %v1380_v55  ;;  %v1823_v2 = vmax.f32 %v1815_v57, 0.0  ;;  %v1806_v9 = vmul.f32 %v2155_v39, %v1794_v60 }
 0x28c   : > { %v2286_v4 = vpop.f32.mrf.mxu1 }
 0x28d   : > { %v1821_v44 = vmax.f32 %v1813_v62, 0.0  ;;  %v1804_v7 = vmul.f32 %v2155_v39, %v1792_v0  ;;  %v1795_v10 = vadd.f32 %v2286_v4, %v1391_v22  ;;  %v1829_v14 = vpack.c.bf16 %v1823_v2, %v1822_v8 }
 0x28e   : > { %v1776_v11 = vpop.f32.mrf.mxu1  ;;  %v1818_v17 = vadd.f32 %v2156_v49, %v1806_v9  ;;  %v2202_v9 = vunpack.c.h.bf16 %v2208_v50 }
 0x28f   : > { %v1828_v12 = vpack.c.bf16 %v1821_v44, %v1820_v6  ;;  %v1793_v13 = vadd.f32 %v1776_v11, %v1383_v5  ;;  %v1807_v15 = vmul.f32 %v2155_v39, %v1795_v10  ;;  %v1816_v3 = vadd.f32 %v2156_v49, %v1804_v7 }
 0x290   : > { %v1826_v25 = vmax.f32 %v1818_v17, 0.0 }
 0x291   : > { %v1805_v16 = vmul.f32 %v2155_v39, %v1793_v13  ;;  %2289 = vmatprep.mubr.msk.bf16.mxu0 %vm1833_vm0, %v1828_v12  ;;  %v1819_v18 = vadd.f32 %v2156_v49, %v1807_v15  ;;  %v1824_v21 = vmax.f32 %v1816_v3, 0.0 }
 0x292   : > { %2290 = vmatmul.mubr.msk.bf16.vlgmr.msra.gmra.mxu0 %vm1833_vm0, %v1829_v14 }
 0x293   : > { %v1817_v19 = vadd.f32 %v2156_v49, %v1805_v16  ;;  %v1827_v20 = vmax.f32 %v1819_v18, 0.0  ;;  %v2209_v49 = vld [vmem:[%s2409_s27 + $0x18] sm:$0xff]  }
 0x294   : > { %v2205_v57 = vunpack.c.l.bf16 %v2209_v49  ;;  %v2206_v2 = vunpack.c.h.bf16 %v2209_v49 }
 0x295   : > { %v1825_v23 = vmax.f32 %v1817_v19, 0.0  ;;  %v1831_v28 = vpack.c.bf16 %v1827_v20, %v1826_v25 }
 0x297   : > { %v1830_v27 = vpack.c.bf16 %v1825_v23, %v1824_v21 }
 0x299   : > { %2293 = vmatprep.mubr.msk.bf16.mxu0 %vm1833_vm0, %v1830_v27 }
 0x29a   : > { %2294 = vmatmul.mubr.msk.bf16.gmra.mxu0 %vm1833_vm0, %v1831_v28 }
 0x352   : > { %v2291_v35 = vpop.f32.mrf.mxu0 }
 0x353   : > { %v1920_v30 = vmul.f32 %v2291_v35, %v2161_v29 }
 0x354   : > { %v1883_v34 = vpop.f32.mrf.mxu0 }
 0x355   : > { %v1932_v36 = vadd.f32 %v2162_v33, %v1920_v30  ;;  %v1918_v37 = vmul.f32 %v2161_v29, %v1883_v34 }
 0x356   : > { %v2292_v31 = vpop.f32.mrf.mxu0 }
 0x357   : > { %v1956_v38 = vadd.f32 %v2197_v26, %v1932_v36  ;;  %v1930_v39 = vadd.f32 %v2162_v33, %v1918_v37  ;;  %v1921_v40 = vmul.f32 %v2292_v31, %v2161_v29 }
 0x358   : > { %v1886_v42 = vpop.f32.mrf.mxu0 }
 0x359   : > { %v1964_v45 = vmax.f32 %v1956_v38, 0.0  ;;  %v1954_v46 = vadd.f32 %v2193_v63, %v1930_v39  ;;  %v1933_v47 = vadd.f32 %v2162_v33, %v1921_v40  ;;  %v1919_v48 = vmul.f32 %v2161_v29, %v1886_v42 }
 0x35a   : > { %v2295_v51 = vpop.f32.mrf.mxu0 }
 0x35b   : > { %v2185_v52 = vpack.c.bf16 %v1964_v45, %v1964_v45  ;;  %v1962_v54 = vmax.f32 %v1954_v46, 0.0  ;;  %v1957_v53 = vadd.f32 %v2198_v41, %v1933_v47  ;;  %v1931_v55 = vadd.f32 %v2162_v33, %v1919_v48 }
 0x35c   : > { %v1924_v56 = vmul.f32 %v2295_v51, %v2161_v29  ;;  %v1899_v58 = vpop.f32.mrf.mxu0 }
 0x35d   : > { %2005 = vst.msk [vmem:[%s2837_s12 + $0x8] sm:$0xf] %vm2002_vm2, %v2185_v52  ;;  %v2183_v60 = vpack.c.bf16 %v1962_v54, %v1962_v54  ;;  %v1965_v61 = vmax.f32 %v1957_v53, 0.0  ;;  %v1955_v62 = vadd.f32 %v2194_v43, %v1931_v55  ;;  %v1922_v0 = vmul.f32 %v2161_v29, %v1899_v58 }
 0x35e   : > { %v1936_v1 = vadd.f32 %v2162_v33, %v1924_v56  ;;  %v2296_v22 = vpop.f32.mrf.mxu0 }
 0x35f   : > { %2003 = vst.msk [vmem:[%s2837_s12] sm:$0xf] %vm2002_vm2, %v2183_v60  ;;  %v2186_v4 = vpack.c.bf16 %v1965_v61, %v1965_v61  ;;  %v1963_v5 = vmax.f32 %v1955_v62, 0.0  ;;  %v1934_v6 = vadd.f32 %v2162_v33, %v1922_v0  ;;  %v1925_v44 = vmul.f32 %v2296_v22, %v2161_v29 }
 0x360   : > { %v1960_v7 = vadd.f32 %v2205_v57, %v1936_v1  ;;  %v1902_v8 = vpop.f32.mrf.mxu0 }
 0x361   : > { %2006 = vst.msk [vmem:[%s2837_s12 + $0xc] sm:$0xf] %vm2002_vm2, %v2186_v4  ;;  %v2184_v10 = vpack.c.bf16 %v1963_v5, %v1963_v5  ;;  %v1958_v11 = vadd.f32 %v2201_v59, %v1934_v6  ;;  %v1937_v12 = vadd.f32 %v2162_v33, %v1925_v44  ;;  %v1923_v13 = vmul.f32 %v2161_v29, %v1902_v8 }
 0x362   : > { %v1968_v14 = vmax.f32 %v1960_v7, 0.0 }
 0x363   : > { %2004 = vst.msk [vmem:[%s2837_s12 + $0x4] sm:$0xf] %vm2002_vm2, %v2184_v10  ;;  %v1966_v15 = vmax.f32 %v1958_v11, 0.0  ;;  %v1961_v3 = vadd.f32 %v2206_v2, %v1937_v12  ;;  %v1935_v16 = vadd.f32 %v2162_v33, %v1923_v13 }
 0x364   : > { %v2189_v17 = vpack.c.bf16 %v1968_v14, %v1968_v14 }
 0x365   : > { %v2187_v18 = vpack.c.bf16 %v1966_v15, %v1966_v15  ;;  %v1969_v19 = vmax.f32 %v1961_v3, 0.0  ;;  %v1959_v20 = vadd.f32 %v2202_v9, %v1935_v16 }
 0x366   : > { %2009 = vst.msk [vmem:[%s2837_s12 + $0x18] sm:$0xf] %vm2002_vm2, %v2189_v17 }
 0x367   : > { %2007 = vst.msk [vmem:[%s2837_s12 + $0x10] sm:$0xf] %vm2002_vm2, %v2187_v18  ;;  %v2190_v21 = vpack.c.bf16 %v1969_v19, %v1969_v19  ;;  %v1967_v23 = vmax.f32 %v1959_v20, 0.0 }
 0x369   : > { %2010 = vst.msk [vmem:[%s2837_s12 + $0x1c] sm:$0xf] %vm2002_vm2, %v2190_v21  ;;  %v2188_v25 = vpack.c.bf16 %v1967_v23, %v1967_v23 }
 0x36b   : > { %2008 = vst.msk [vmem:[%s2837_s12 + $0x14] sm:$0xf] %vm2002_vm2, %v2188_v25 }
 0x36c PF: > { %s15_s18 = sadd.s32 1, %s2344_s18  }
 0x36d   : > { %p12_p4 = scmp.ge.s32.totalorder %s15_s18, 4  }
 0x36f   :  { %14 = sbr.rel (!%p12_p4) target bundleno = 1 (0x1), region = 75 }

</bundles_post_ra>
